<compile_context>
chip_gen: v7x
topology: tpu7x:2x2x1
jax: 0.10.0
libtpu: 0.0.40
codegen_flags: <defaults>
</compile_context>

<pallas_src>
import math

import jax
import jax.numpy as jnp
from jax.experimental import pallas as pl
from jax.experimental.pallas import tpu as pltpu

LEAK = 0.01  # PyTorch nn.LeakyReLU default negative_slope


def _leaky(x):
    return jnp.where(x >= 0, x, LEAK * x)


def _bf16(x):
    return x.astype(jnp.bfloat16)


def _distance_kernel(
    sup_ref, inp_ref,
    # direction_net: Linear(512,256) split (256|256), then 256->128->64->32->6
    dW1s, dW1i, db1, dW2, db2, dW3, db3, dW4, db4, dW5, db5,
    # similarity_net: Linear(516,256) split (256|256|4), then 256->128->64->32->1
    sWs, sWi, sWp, sb1, sW2, sb2, sW3, sb3, sW4, sb4, sW5, sb5,
    out_ref,
):
    Jt, N, _ = out_ref.shape
    R = Jt * N

    # LeakyReLU of the (virtual) embedding halves, computed once, reused by both nets.
    sup_l = _leaky(sup_ref[...].astype(jnp.float32))   # [Jt, 256]
    inp_l = _leaky(inp_ref[...].astype(jnp.float32))   # [N, 256]
    sup_b = _bf16(sup_l)
    inp_b = _bf16(inp_l)

    def dot(a, w):
        return jnp.dot(a, w[...], preferred_element_type=jnp.float32)

    # ---- direction_net ----
    d_sup = dot(sup_b, dW1s)                           # [Jt, 256]
    d_inp = dot(inp_b, dW1i)                           # [N, 256]  (j-invariant, once)
    h = _leaky(d_sup[:, None, :] + d_inp[None, :, :] + db1[...]).reshape(R, 256)
    h = _leaky(dot(_bf16(h), dW2) + db2[...])
    h = _leaky(dot(_bf16(h), dW3) + db3[...])
    h = _leaky(dot(_bf16(h), dW4) + db4[...])
    dv = dot(_bf16(h), dW5) + db5[...]                 # [R, 6]

    delta = dv[:, 0:2]                                 # [R, 2]
    logits = dv[:, 2:6]                                # [R, 4] == dv[:, -4:]
    logits = logits - jnp.max(logits, axis=-1, keepdims=True)
    ex = jnp.exp(logits)
    prob = ex * pl.reciprocal(jnp.sum(ex, axis=-1, keepdims=True), approx=True)

    # ---- similarity_net on cat([support, input, prob]) ----
    s_sup = dot(sup_b, sWs)                            # [Jt, 256]
    s_inp = dot(inp_b, sWi)                            # [N, 256]  (j-invariant, once)
    s_p = dot(_bf16(_leaky(prob)), sWp)                # [R, 256]
    g = (s_sup[:, None, :] + s_inp[None, :, :]).reshape(R, 256) + s_p + sb1[...]
    g = _leaky(g)
    g = _leaky(dot(_bf16(g), sW2) + sb2[...])
    g = _leaky(dot(_bf16(g), sW3) + sb3[...])
    g = _leaky(dot(_bf16(g), sW4) + sb4[...])
    sim = dot(_bf16(g), sW5) + sb5[...]                # [R, 1]

    # Single lane-packed output (sim | delta | prob | pad) written once.
    packed = jnp.concatenate(
        [sim, delta, prob, jnp.zeros((R, 1), jnp.float32)], axis=-1)   # [R, 8]
    out_ref[...] = packed.reshape(Jt, N, 8)


def _const_spec(a):
    zeros = (0,) * a.ndim
    return pl.BlockSpec(a.shape, lambda g, _z=zeros: _z)


def distance_network_forward(support_set, input_image, y_c, params, *, j_tile=None):
    """support_set: [J, 256]; input_image: [N, 256]; y_c: [1, J, 2]."""
    J, S = support_set.shape
    N, D = input_image.shape

    if j_tile is None:
        j_tile = J                      # single grid step by default
    assert J % j_tile == 0, "j_tile must divide J"
    n_tiles = J // j_tile

    sup = support_set.astype(jnp.float32)
    inp = input_image.astype(jnp.float32)

    (dW1, db1), (dW2, db2), (dW3, db3), (dW4, db4), (dW5, db5) = params["dir"]
    (sW1, sb1), (sW2, sb2), (sW3, sb3), (sW4, sb4), (sW5, sb5) = params["sim"]
    # Split the concat-shaped first layers so no 512/516-wide embedding is built.
    dW1s, dW1i = dW1[:S, :], dW1[S:, :]
    sWs, sWi, sWp = sW1[:S, :], sW1[S:S + D, :], sW1[S + D:, :]

    def w(x):  # matmul operands in bf16 (MXU-native); biases stay f32
        return x.astype(jnp.bfloat16)

    weight_args = [
        w(dW1s), w(dW1i), db1, w(dW2), db2, w(dW3), db3, w(dW4), db4, w(dW5), db5,
        w(sWs), w(sWi), w(sWp), sb1, w(sW2), sb2, w(sW3), sb3, w(sW4), sb4, w(sW5), sb5,
    ]

    in_specs = [
        pl.BlockSpec((j_tile, S), lambda g: (g, 0)),
        pl.BlockSpec((N, D), lambda g: (0, 0)),       # constant index -> loaded once
    ] + [_const_spec(a) for a in weight_args]

    out_spec = pl.BlockSpec((j_tile, N, 8), lambda g: (g, 0, 0))
    out_shape = jax.ShapeDtypeStruct((J, N, 8), jnp.float32)

    packed = pl.pallas_call(
        _distance_kernel,
        out_shape=out_shape,
        grid_spec=pltpu.PrefetchScalarGridSpec(
            num_scalar_prefetch=0,
            grid=(n_tiles,),
            in_specs=in_specs,
            out_specs=out_spec,
        ),
        compiler_params=pltpu.CompilerParams(
            # No carried state across support tiles -> let v7x shard across TCs.
            dimension_semantics=("parallel",)),
    )(sup, inp, *weight_args)

    sim = packed[..., 0:1]                               # [J, N, 1]
    delta = packed[..., 1:3]                             # [J, N, 2]
    dps = packed[..., 3:7]                               # [J, N, 4]

    # y_s = y_c + delta done in plain JAX (dropped from the kernel per review).
    ys = y_c[0].astype(jnp.float32)[:, None, :] + delta  # [J, N, 2]

    # Match the PyTorch return structure.
    similarities = [sim[j] for j in range(J)]
    y_s = [ys[j] for j in range(J)]
    direction_probs = jnp.transpose(dps, (1, 0, 2))      # stack -> transpose(0,1)
    return similarities, y_s, direction_probs


# ---------------- parameter init & pure-JAX reference ----------------

def _linear_init(key, fan_in, fan_out):
    kw, kb = jax.random.split(key)
    bound = 1.0 / math.sqrt(fan_in)
    W = jax.random.uniform(kw, (fan_in, fan_out), jnp.float32, -bound, bound)
    b = jax.random.uniform(kb, (1, fan_out), jnp.float32, -bound, bound)
    return W, b


def init_params(key):
    sim_dims = [512 + 4, 256, 128, 64, 32, 1]
    dir_dims = [512, 256, 128, 64, 32, 6]
    keys = jax.random.split(key, len(sim_dims) - 1 + len(dir_dims) - 1)
    params = {"sim": [], "dir": []}
    ki = 0
    for i in range(len(sim_dims) - 1):
        params["sim"].append(_linear_init(keys[ki], sim_dims[i], sim_dims[i + 1]))
        ki += 1
    for i in range(len(dir_dims) - 1):
        params["dir"].append(_linear_init(keys[ki], dir_dims[i], dir_dims[i + 1]))
        ki += 1
    return params


def ref_forward(support_set, input_image, y_c, params):
    """Pure-JAX f32 mirror of the PyTorch forward, for correctness checking."""
    J = support_set.shape[0]
    N = input_image.shape[0]
    sims, ys, dps = [], [], []
    for j in range(J):
        sup = jnp.broadcast_to(support_set[j][None, :], (N, support_set.shape[1]))
        emb = jnp.concatenate([sup, input_image], axis=1)                 # [N, 512]
        x = emb
        for W, b in params["dir"]:
            x = _leaky(x) @ W + b
        dv = x                                                            # [N, 6]
        delta = dv[:, :2]
        prob = jax.nn.softmax(dv[:, -4:], axis=1)
        x = jnp.concatenate([emb, prob], axis=1)                          # [N, 516]
        for W, b in params["sim"]:
            x = _leaky(x) @ W + b
        sims.append(x)
        ys.append(y_c[0, j] + delta)
        dps.append(prob)
    return sims, ys, jnp.transpose(jnp.stack(dps), (1, 0, 2))


if __name__ == "__main__":
    key = jax.random.PRNGKey(0)
    k_par, k_sup, k_inp, k_yc = jax.random.split(key, 4)

    J, N, Fhalf = 4, 8, 256  # 4 support images, batch of 8, 256-d halves (512 total)
    params = init_params(k_par)
    support_set = jax.random.normal(k_sup, (J, Fhalf), jnp.float32)
    input_image = jax.random.normal(k_inp, (N, Fhalf), jnp.float32)
    y_c = jax.random.normal(k_yc, (1, J, 2), jnp.float32)

    sims, y_s, dps = distance_network_forward(support_set, input_image, y_c, params)
    jax.block_until_ready(dps)

    r_sims, r_ys, r_dps = ref_forward(support_set, input_image, y_c, params)
    # bf16 matmuls + approximate reciprocal in the kernel -> loosened tolerances
    # against the pure-f32 reference.
    for a, b in zip(sims, r_sims):
        assert jnp.allclose(a, b, atol=2e-2, rtol=2e-2), "similarity mismatch"
    for a, b in zip(y_s, r_ys):
        assert jnp.allclose(a, b, atol=2e-2, rtol=2e-2), "y_s mismatch"
    assert jnp.allclose(dps, r_dps, atol=2e-2, rtol=2e-2), "direction_probs mismatch"

    print("KERNEL_OK")
</pallas_src>

<mosaic_0001>
module attributes {stable_mosaic.version = 11 : i64} {
  func.func @_distance_kernel(%arg0: i32, %arg1: memref<4x256xf32, #tpu.memory_space<vmem>>, %arg2: memref<8x256xf32, #tpu.memory_space<vmem>>, %arg3: memref<256x256xbf16, #tpu.memory_space<vmem>>, %arg4: memref<256x256xbf16, #tpu.memory_space<vmem>>, %arg5: memref<1x256xf32, #tpu.memory_space<vmem>>, %arg6: memref<256x128xbf16, #tpu.memory_space<vmem>>, %arg7: memref<1x128xf32, #tpu.memory_space<vmem>>, %arg8: memref<128x64xbf16, #tpu.memory_space<vmem>>, %arg9: memref<1x64xf32, #tpu.memory_space<vmem>>, %arg10: memref<64x32xbf16, #tpu.memory_space<vmem>>, %arg11: memref<1x32xf32, #tpu.memory_space<vmem>>, %arg12: memref<32x6xbf16, #tpu.memory_space<vmem>>, %arg13: memref<1x6xf32, #tpu.memory_space<vmem>>, %arg14: memref<256x256xbf16, #tpu.memory_space<vmem>>, %arg15: memref<256x256xbf16, #tpu.memory_space<vmem>>, %arg16: memref<4x256xbf16, #tpu.memory_space<vmem>>, %arg17: memref<1x256xf32, #tpu.memory_space<vmem>>, %arg18: memref<256x128xbf16, #tpu.memory_space<vmem>>, %arg19: memref<1x128xf32, #tpu.memory_space<vmem>>, %arg20: memref<128x64xbf16, #tpu.memory_space<vmem>>, %arg21: memref<1x64xf32, #tpu.memory_space<vmem>>, %arg22: memref<64x32xbf16, #tpu.memory_space<vmem>>, %arg23: memref<1x32xf32, #tpu.memory_space<vmem>>, %arg24: memref<32x1xbf16, #tpu.memory_space<vmem>>, %arg25: memref<1x1xf32, #tpu.memory_space<vmem>>, %arg26: memref<4x8x8xf32, #tpu.memory_space<vmem>>) attributes {dimension_semantics = [#tpu.dimension_semantics<parallel>], iteration_bounds = array<i64: 1>, scalar_prefetch = 0 : i64, scratch_operands = 0 : i64, tpu.core_type = #tpu.core_type<tc>, window_params = [{transform_indices = @transform_0, window_bounds = array<i64: 4, 256>}, {pipeline_mode = #tpu.pipeline_mode<synchronous>, transform_indices = @transform_1, window_bounds = array<i64: 8, 256>}, {pipeline_mode = #tpu.pipeline_mode<synchronous>, transform_indices = @transform_2, window_bounds = array<i64: 256, 256>}, {pipeline_mode = #tpu.pipeline_mode<synchronous>, transform_indices = @transform_3, window_bounds = array<i64: 256, 256>}, {pipeline_mode = #tpu.pipeline_mode<synchronous>, transform_indices = @transform_4, window_bounds = array<i64: 1, 256>}, {pipeline_mode = #tpu.pipeline_mode<synchronous>, transform_indices = @transform_5, window_bounds = array<i64: 256, 128>}, {pipeline_mode = #tpu.pipeline_mode<synchronous>, transform_indices = @transform_6, window_bounds = array<i64: 1, 128>}, {pipeline_mode = #tpu.pipeline_mode<synchronous>, transform_indices = @transform_7, window_bounds = array<i64: 128, 64>}, {pipeline_mode = #tpu.pipeline_mode<synchronous>, transform_indices = @transform_8, window_bounds = array<i64: 1, 64>}, {pipeline_mode = #tpu.pipeline_mode<synchronous>, transform_indices = @transform_9, window_bounds = array<i64: 64, 32>}, {pipeline_mode = #tpu.pipeline_mode<synchronous>, transform_indices = @transform_10, window_bounds = array<i64: 1, 32>}, {pipeline_mode = #tpu.pipeline_mode<synchronous>, transform_indices = @transform_11, window_bounds = array<i64: 32, 6>}, {pipeline_mode = #tpu.pipeline_mode<synchronous>, transform_indices = @transform_12, window_bounds = array<i64: 1, 6>}, {pipeline_mode = #tpu.pipeline_mode<synchronous>, transform_indices = @transform_13, window_bounds = array<i64: 256, 256>}, {pipeline_mode = #tpu.pipeline_mode<synchronous>, transform_indices = @transform_14, window_bounds = array<i64: 256, 256>}, {pipeline_mode = #tpu.pipeline_mode<synchronous>, transform_indices = @transform_15, window_bounds = array<i64: 4, 256>}, {pipeline_mode = #tpu.pipeline_mode<synchronous>, transform_indices = @transform_16, window_bounds = array<i64: 1, 256>}, {pipeline_mode = #tpu.pipeline_mode<synchronous>, transform_indices = @transform_17, window_bounds = array<i64: 256, 128>}, {pipeline_mode = #tpu.pipeline_mode<synchronous>, transform_indices = @transform_18, window_bounds = array<i64: 1, 128>}, {pipeline_mode = #tpu.pipeline_mode<synchronous>, transform_indices = @transform_19, window_bounds = array<i64: 128, 64>}, {pipeline_mode = #tpu.pipeline_mode<synchronous>, transform_indices = @transform_20, window_bounds = array<i64: 1, 64>}, {pipeline_mode = #tpu.pipeline_mode<synchronous>, transform_indices = @transform_21, window_bounds = array<i64: 64, 32>}, {pipeline_mode = #tpu.pipeline_mode<synchronous>, transform_indices = @transform_22, window_bounds = array<i64: 1, 32>}, {pipeline_mode = #tpu.pipeline_mode<synchronous>, transform_indices = @transform_23, window_bounds = array<i64: 32, 1>}, {pipeline_mode = #tpu.pipeline_mode<synchronous>, transform_indices = @transform_24, window_bounds = array<i64: 1, 1>}, {transform_indices = @transform_25, window_bounds = array<i64: 4, 8, 8>}]} {
    %c0 = arith.constant 0 : index
    %c0_0 = arith.constant 0 : index
    %0 = vector.load %arg1[%c0, %c0_0] : memref<4x256xf32, #tpu.memory_space<vmem>>, vector<4x256xf32>
    %cst = arith.constant 0.000000e+00 : f32
    %1 = vector.broadcast %cst : f32 to vector<4x256xf32>
    %2 = arith.cmpf oge, %0, %1 : vector<4x256xf32>
    %cst_1 = arith.constant 0.00999999977 : f32
    %3 = vector.broadcast %cst_1 : f32 to vector<4x256xf32>
    %4 = arith.mulf %3, %0 : vector<4x256xf32>
    %5 = arith.select %2, %0, %4 : vector<4x256xi1>, vector<4x256xf32>
    %c0_2 = arith.constant 0 : index
    %c0_3 = arith.constant 0 : index
    %6 = vector.load %arg2[%c0_2, %c0_3] : memref<8x256xf32, #tpu.memory_space<vmem>>, vector<8x256xf32>
    %cst_4 = arith.constant 0.000000e+00 : f32
    %7 = vector.broadcast %cst_4 : f32 to vector<8x256xf32>
    %8 = arith.cmpf oge, %6, %7 : vector<8x256xf32>
    %cst_5 = arith.constant 0.00999999977 : f32
    %9 = vector.broadcast %cst_5 : f32 to vector<8x256xf32>
    %10 = arith.mulf %9, %6 : vector<8x256xf32>
    %11 = arith.select %8, %6, %10 : vector<8x256xi1>, vector<8x256xf32>
    %12 = arith.truncf %5 : vector<4x256xf32> to vector<4x256xbf16>
    %13 = arith.truncf %11 : vector<8x256xf32> to vector<8x256xbf16>
    %c0_6 = arith.constant 0 : index
    %c0_7 = arith.constant 0 : index
    %14 = vector.load %arg3[%c0_6, %c0_7] : memref<256x256xbf16, #tpu.memory_space<vmem>>, vector<256x256xbf16>
    %cst_8 = arith.constant dense<0.000000e+00> : vector<4x256xf32>
    %15 = tpu.matmul %12, %14, %cst_8 {dimension_numbers = #tpu.dot_dimension_numbers<[1], [0], [0], [1], [0, 0, 1, 1], [], []>} : vector<4x256xbf16>, vector<256x256xbf16>, vector<4x256xf32> -> vector<4x256xf32>
    %c0_9 = arith.constant 0 : index
    %c0_10 = arith.constant 0 : index
    %16 = vector.load %arg4[%c0_9, %c0_10] : memref<256x256xbf16, #tpu.memory_space<vmem>>, vector<256x256xbf16>
    %cst_11 = arith.constant dense<0.000000e+00> : vector<8x256xf32>
    %17 = tpu.matmul %13, %16, %cst_11 {dimension_numbers = #tpu.dot_dimension_numbers<[1], [0], [0], [1], [0, 0, 1, 1], [], []>} : vector<8x256xbf16>, vector<256x256xbf16>, vector<8x256xf32> -> vector<8x256xf32>
    %18 = vector.shape_cast %15 : vector<4x256xf32> to vector<4x1x256xf32>
    %19 = vector.shape_cast %17 : vector<8x256xf32> to vector<1x8x256xf32>
    %20 = vector.broadcast %18 : vector<4x1x256xf32> to vector<4x8x256xf32>
    %21 = vector.broadcast %19 : vector<1x8x256xf32> to vector<4x8x256xf32>
    %22 = arith.addf %20, %21 : vector<4x8x256xf32>
    %c0_12 = arith.constant 0 : index
    %c0_13 = arith.constant 0 : index
    %23 = vector.load %arg5[%c0_12, %c0_13] : memref<1x256xf32, #tpu.memory_space<vmem>>, vector<1x256xf32>
    %24 = vector.shape_cast %23 : vector<1x256xf32> to vector<1x1x256xf32>
    %25 = vector.broadcast %24 : vector<1x1x256xf32> to vector<4x8x256xf32>
    %26 = arith.addf %22, %25 : vector<4x8x256xf32>
    %cst_14 = arith.constant 0.000000e+00 : f32
    %27 = vector.broadcast %cst_14 : f32 to vector<4x8x256xf32>
    %28 = arith.cmpf oge, %26, %27 : vector<4x8x256xf32>
    %cst_15 = arith.constant 0.00999999977 : f32
    %29 = vector.broadcast %cst_15 : f32 to vector<4x8x256xf32>
    %30 = arith.mulf %29, %26 : vector<4x8x256xf32>
    %31 = arith.select %28, %26, %30 : vector<4x8x256xi1>, vector<4x8x256xf32>
    %32 = vector.shape_cast %31 : vector<4x8x256xf32> to vector<32x256xf32>
    %33 = arith.truncf %32 : vector<32x256xf32> to vector<32x256xbf16>
    %c0_16 = arith.constant 0 : index
    %c0_17 = arith.constant 0 : index
    %34 = vector.load %arg6[%c0_16, %c0_17] : memref<256x128xbf16, #tpu.memory_space<vmem>>, vector<256x128xbf16>
    %cst_18 = arith.constant dense<0.000000e+00> : vector<32x128xf32>
    %35 = tpu.matmul %33, %34, %cst_18 {dimension_numbers = #tpu.dot_dimension_numbers<[1], [0], [0], [1], [0, 0, 1, 1], [], []>} : vector<32x256xbf16>, vector<256x128xbf16>, vector<32x128xf32> -> vector<32x128xf32>
    %c0_19 = arith.constant 0 : index
    %c0_20 = arith.constant 0 : index
    %36 = vector.load %arg7[%c0_19, %c0_20] : memref<1x128xf32, #tpu.memory_space<vmem>>, vector<1x128xf32>
    %37 = vector.broadcast %36 : vector<1x128xf32> to vector<32x128xf32>
    %38 = arith.addf %35, %37 : vector<32x128xf32>
    %cst_21 = arith.constant 0.000000e+00 : f32
    %39 = vector.broadcast %cst_21 : f32 to vector<32x128xf32>
    %40 = arith.cmpf oge, %38, %39 : vector<32x128xf32>
    %cst_22 = arith.constant 0.00999999977 : f32
    %41 = vector.broadcast %cst_22 : f32 to vector<32x128xf32>
    %42 = arith.mulf %41, %38 : vector<32x128xf32>
    %43 = arith.select %40, %38, %42 : vector<32x128xi1>, vector<32x128xf32>
    %44 = arith.truncf %43 : vector<32x128xf32> to vector<32x128xbf16>
    %c0_23 = arith.constant 0 : index
    %c0_24 = arith.constant 0 : index
    %45 = vector.load %arg8[%c0_23, %c0_24] : memref<128x64xbf16, #tpu.memory_space<vmem>>, vector<128x64xbf16>
    %cst_25 = arith.constant dense<0.000000e+00> : vector<32x64xf32>
    %46 = tpu.matmul %44, %45, %cst_25 {dimension_numbers = #tpu.dot_dimension_numbers<[1], [0], [0], [1], [0, 0, 1, 1], [], []>} : vector<32x128xbf16>, vector<128x64xbf16>, vector<32x64xf32> -> vector<32x64xf32>
    %c0_26 = arith.constant 0 : index
    %c0_27 = arith.constant 0 : index
    %47 = vector.load %arg9[%c0_26, %c0_27] : memref<1x64xf32, #tpu.memory_space<vmem>>, vector<1x64xf32>
    %48 = vector.broadcast %47 : vector<1x64xf32> to vector<32x64xf32>
    %49 = arith.addf %46, %48 : vector<32x64xf32>
    %cst_28 = arith.constant 0.000000e+00 : f32
    %50 = vector.broadcast %cst_28 : f32 to vector<32x64xf32>
    %51 = arith.cmpf oge, %49, %50 : vector<32x64xf32>
    %cst_29 = arith.constant 0.00999999977 : f32
    %52 = vector.broadcast %cst_29 : f32 to vector<32x64xf32>
    %53 = arith.mulf %52, %49 : vector<32x64xf32>
    %54 = arith.select %51, %49, %53 : vector<32x64xi1>, vector<32x64xf32>
    %55 = arith.truncf %54 : vector<32x64xf32> to vector<32x64xbf16>
    %c0_30 = arith.constant 0 : index
    %c0_31 = arith.constant 0 : index
    %56 = vector.load %arg10[%c0_30, %c0_31] : memref<64x32xbf16, #tpu.memory_space<vmem>>, vector<64x32xbf16>
    %cst_32 = arith.constant dense<0.000000e+00> : vector<32x32xf32>
    %57 = tpu.matmul %55, %56, %cst_32 {dimension_numbers = #tpu.dot_dimension_numbers<[1], [0], [0], [1], [0, 0, 1, 1], [], []>} : vector<32x64xbf16>, vector<64x32xbf16>, vector<32x32xf32> -> vector<32x32xf32>
    %c0_33 = arith.constant 0 : index
    %c0_34 = arith.constant 0 : index
    %58 = vector.load %arg11[%c0_33, %c0_34] : memref<1x32xf32, #tpu.memory_space<vmem>>, vector<1x32xf32>
    %59 = vector.broadcast %58 : vector<1x32xf32> to vector<32x32xf32>
    %60 = arith.addf %57, %59 : vector<32x32xf32>
    %cst_35 = arith.constant 0.000000e+00 : f32
    %61 = vector.broadcast %cst_35 : f32 to vector<32x32xf32>
    %62 = arith.cmpf oge, %60, %61 : vector<32x32xf32>
    %cst_36 = arith.constant 0.00999999977 : f32
    %63 = vector.broadcast %cst_36 : f32 to vector<32x32xf32>
    %64 = arith.mulf %63, %60 : vector<32x32xf32>
    %65 = arith.select %62, %60, %64 : vector<32x32xi1>, vector<32x32xf32>
    %66 = arith.truncf %65 : vector<32x32xf32> to vector<32x32xbf16>
    %c0_37 = arith.constant 0 : index
    %c0_38 = arith.constant 0 : index
    %67 = vector.load %arg12[%c0_37, %c0_38] : memref<32x6xbf16, #tpu.memory_space<vmem>>, vector<32x6xbf16>
    %cst_39 = arith.constant dense<0.000000e+00> : vector<32x6xf32>
    %68 = tpu.matmul %66, %67, %cst_39 {dimension_numbers = #tpu.dot_dimension_numbers<[1], [0], [0], [1], [0, 0, 1, 1], [], []>} : vector<32x32xbf16>, vector<32x6xbf16>, vector<32x6xf32> -> vector<32x6xf32>
    %c0_40 = arith.constant 0 : index
    %c0_41 = arith.constant 0 : index
    %69 = vector.load %arg13[%c0_40, %c0_41] : memref<1x6xf32, #tpu.memory_space<vmem>>, vector<1x6xf32>
    %70 = vector.broadcast %69 : vector<1x6xf32> to vector<32x6xf32>
    %71 = arith.addf %68, %70 : vector<32x6xf32>
    %72 = vector.extract_strided_slice %71 {offsets = [0, 0], sizes = [32, 2], strides = [1, 1]} : vector<32x6xf32> to vector<32x2xf32>
    %73 = vector.extract_strided_slice %71 {offsets = [0, 2], sizes = [32, 4], strides = [1, 1]} : vector<32x6xf32> to vector<32x4xf32>
    %cst_42 = arith.constant dense<0xFF800000> : vector<32xf32>
    %74 = vector.multi_reduction <maximumf>, %73, %cst_42 [1] : vector<32x4xf32> to vector<32xf32>
    %75 = vector.shape_cast %74 : vector<32xf32> to vector<32x1xf32>
    %76 = vector.broadcast %75 : vector<32x1xf32> to vector<32x4xf32>
    %77 = arith.subf %73, %76 : vector<32x4xf32>
    %78 = math.exp %77 : vector<32x4xf32>
    %cst_43 = arith.constant dense<0.000000e+00> : vector<32xf32>
    %79 = vector.multi_reduction <add>, %78, %cst_43 [1] : vector<32x4xf32> to vector<32xf32>
    %80 = vector.shape_cast %79 : vector<32xf32> to vector<32x1xf32>
    %81 = tpu.reciprocal %80 {approx = true} : vector<32x1xf32> -> vector<32x1xf32>
    %82 = vector.broadcast %81 : vector<32x1xf32> to vector<32x4xf32>
    %83 = arith.mulf %78, %82 : vector<32x4xf32>
    %c0_44 = arith.constant 0 : index
    %c0_45 = arith.constant 0 : index
    %84 = vector.load %arg14[%c0_44, %c0_45] : memref<256x256xbf16, #tpu.memory_space<vmem>>, vector<256x256xbf16>
    %cst_46 = arith.constant dense<0.000000e+00> : vector<4x256xf32>
    %85 = tpu.matmul %12, %84, %cst_46 {dimension_numbers = #tpu.dot_dimension_numbers<[1], [0], [0], [1], [0, 0, 1, 1], [], []>} : vector<4x256xbf16>, vector<256x256xbf16>, vector<4x256xf32> -> vector<4x256xf32>
    %c0_47 = arith.constant 0 : index
    %c0_48 = arith.constant 0 : index
    %86 = vector.load %arg15[%c0_47, %c0_48] : memref<256x256xbf16, #tpu.memory_space<vmem>>, vector<256x256xbf16>
    %cst_49 = arith.constant dense<0.000000e+00> : vector<8x256xf32>
    %87 = tpu.matmul %13, %86, %cst_49 {dimension_numbers = #tpu.dot_dimension_numbers<[1], [0], [0], [1], [0, 0, 1, 1], [], []>} : vector<8x256xbf16>, vector<256x256xbf16>, vector<8x256xf32> -> vector<8x256xf32>
    %cst_50 = arith.constant 0.000000e+00 : f32
    %88 = vector.broadcast %cst_50 : f32 to vector<32x4xf32>
    %89 = arith.cmpf oge, %83, %88 : vector<32x4xf32>
    %cst_51 = arith.constant 0.00999999977 : f32
    %90 = vector.broadcast %cst_51 : f32 to vector<32x4xf32>
    %91 = arith.mulf %90, %83 : vector<32x4xf32>
    %92 = arith.select %89, %83, %91 : vector<32x4xi1>, vector<32x4xf32>
    %93 = arith.truncf %92 : vector<32x4xf32> to vector<32x4xbf16>
    %c0_52 = arith.constant 0 : index
    %c0_53 = arith.constant 0 : index
    %94 = vector.load %arg16[%c0_52, %c0_53] : memref<4x256xbf16, #tpu.memory_space<vmem>>, vector<4x256xbf16>
    %cst_54 = arith.constant dense<0.000000e+00> : vector<32x256xf32>
    %95 = tpu.matmul %93, %94, %cst_54 {dimension_numbers = #tpu.dot_dimension_numbers<[1], [0], [0], [1], [0, 0, 1, 1], [], []>} : vector<32x4xbf16>, vector<4x256xbf16>, vector<32x256xf32> -> vector<32x256xf32>
    %96 = vector.shape_cast %85 : vector<4x256xf32> to vector<4x1x256xf32>
    %97 = vector.shape_cast %87 : vector<8x256xf32> to vector<1x8x256xf32>
    %98 = vector.broadcast %96 : vector<4x1x256xf32> to vector<4x8x256xf32>
    %99 = vector.broadcast %97 : vector<1x8x256xf32> to vector<4x8x256xf32>
    %100 = arith.addf %98, %99 : vector<4x8x256xf32>
    %101 = vector.shape_cast %100 : vector<4x8x256xf32> to vector<32x256xf32>
    %102 = arith.addf %101, %95 : vector<32x256xf32>
    %c0_55 = arith.constant 0 : index
    %c0_56 = arith.constant 0 : index
    %103 = vector.load %arg17[%c0_55, %c0_56] : memref<1x256xf32, #tpu.memory_space<vmem>>, vector<1x256xf32>
    %104 = vector.broadcast %103 : vector<1x256xf32> to vector<32x256xf32>
    %105 = arith.addf %102, %104 : vector<32x256xf32>
    %cst_57 = arith.constant 0.000000e+00 : f32
    %106 = vector.broadcast %cst_57 : f32 to vector<32x256xf32>
    %107 = arith.cmpf oge, %105, %106 : vector<32x256xf32>
    %cst_58 = arith.constant 0.00999999977 : f32
    %108 = vector.broadcast %cst_58 : f32 to vector<32x256xf32>
    %109 = arith.mulf %108, %105 : vector<32x256xf32>
    %110 = arith.select %107, %105, %109 : vector<32x256xi1>, vector<32x256xf32>
    %111 = arith.truncf %110 : vector<32x256xf32> to vector<32x256xbf16>
    %c0_59 = arith.constant 0 : index
    %c0_60 = arith.constant 0 : index
    %112 = vector.load %arg18[%c0_59, %c0_60] : memref<256x128xbf16, #tpu.memory_space<vmem>>, vector<256x128xbf16>
    %cst_61 = arith.constant dense<0.000000e+00> : vector<32x128xf32>
    %113 = tpu.matmul %111, %112, %cst_61 {dimension_numbers = #tpu.dot_dimension_numbers<[1], [0], [0], [1], [0, 0, 1, 1], [], []>} : vector<32x256xbf16>, vector<256x128xbf16>, vector<32x128xf32> -> vector<32x128xf32>
    %c0_62 = arith.constant 0 : index
    %c0_63 = arith.constant 0 : index
    %114 = vector.load %arg19[%c0_62, %c0_63] : memref<1x128xf32, #tpu.memory_space<vmem>>, vector<1x128xf32>
    %115 = vector.broadcast %114 : vector<1x128xf32> to vector<32x128xf32>
    %116 = arith.addf %113, %115 : vector<32x128xf32>
    %cst_64 = arith.constant 0.000000e+00 : f32
    %117 = vector.broadcast %cst_64 : f32 to vector<32x128xf32>
    %118 = arith.cmpf oge, %116, %117 : vector<32x128xf32>
    %cst_65 = arith.constant 0.00999999977 : f32
    %119 = vector.broadcast %cst_65 : f32 to vector<32x128xf32>
    %120 = arith.mulf %119, %116 : vector<32x128xf32>
    %121 = arith.select %118, %116, %120 : vector<32x128xi1>, vector<32x128xf32>
    %122 = arith.truncf %121 : vector<32x128xf32> to vector<32x128xbf16>
    %c0_66 = arith.constant 0 : index
    %c0_67 = arith.constant 0 : index
    %123 = vector.load %arg20[%c0_66, %c0_67] : memref<128x64xbf16, #tpu.memory_space<vmem>>, vector<128x64xbf16>
    %cst_68 = arith.constant dense<0.000000e+00> : vector<32x64xf32>
    %124 = tpu.matmul %122, %123, %cst_68 {dimension_numbers = #tpu.dot_dimension_numbers<[1], [0], [0], [1], [0, 0, 1, 1], [], []>} : vector<32x128xbf16>, vector<128x64xbf16>, vector<32x64xf32> -> vector<32x64xf32>
    %c0_69 = arith.constant 0 : index
    %c0_70 = arith.constant 0 : index
    %125 = vector.load %arg21[%c0_69, %c0_70] : memref<1x64xf32, #tpu.memory_space<vmem>>, vector<1x64xf32>
    %126 = vector.broadcast %125 : vector<1x64xf32> to vector<32x64xf32>
    %127 = arith.addf %124, %126 : vector<32x64xf32>
    %cst_71 = arith.constant 0.000000e+00 : f32
    %128 = vector.broadcast %cst_71 : f32 to vector<32x64xf32>
    %129 = arith.cmpf oge, %127, %128 : vector<32x64xf32>
    %cst_72 = arith.constant 0.00999999977 : f32
    %130 = vector.broadcast %cst_72 : f32 to vector<32x64xf32>
    %131 = arith.mulf %130, %127 : vector<32x64xf32>
    %132 = arith.select %129, %127, %131 : vector<32x64xi1>, vector<32x64xf32>
    %133 = arith.truncf %132 : vector<32x64xf32> to vector<32x64xbf16>
    %c0_73 = arith.constant 0 : index
    %c0_74 = arith.constant 0 : index
    %134 = vector.load %arg22[%c0_73, %c0_74] : memref<64x32xbf16, #tpu.memory_space<vmem>>, vector<64x32xbf16>
    %cst_75 = arith.constant dense<0.000000e+00> : vector<32x32xf32>
    %135 = tpu.matmul %133, %134, %cst_75 {dimension_numbers = #tpu.dot_dimension_numbers<[1], [0], [0], [1], [0, 0, 1, 1], [], []>} : vector<32x64xbf16>, vector<64x32xbf16>, vector<32x32xf32> -> vector<32x32xf32>
    %c0_76 = arith.constant 0 : index
    %c0_77 = arith.constant 0 : index
    %136 = vector.load %arg23[%c0_76, %c0_77] : memref<1x32xf32, #tpu.memory_space<vmem>>, vector<1x32xf32>
    %137 = vector.broadcast %136 : vector<1x32xf32> to vector<32x32xf32>
    %138 = arith.addf %135, %137 : vector<32x32xf32>
    %cst_78 = arith.constant 0.000000e+00 : f32
    %139 = vector.broadcast %cst_78 : f32 to vector<32x32xf32>
    %140 = arith.cmpf oge, %138, %139 : vector<32x32xf32>
    %cst_79 = arith.constant 0.00999999977 : f32
    %141 = vector.broadcast %cst_79 : f32 to vector<32x32xf32>
    %142 = arith.mulf %141, %138 : vector<32x32xf32>
    %143 = arith.select %140, %138, %142 : vector<32x32xi1>, vector<32x32xf32>
    %144 = arith.truncf %143 : vector<32x32xf32> to vector<32x32xbf16>
    %c0_80 = arith.constant 0 : index
    %c0_81 = arith.constant 0 : index
    %145 = vector.load %arg24[%c0_80, %c0_81] : memref<32x1xbf16, #tpu.memory_space<vmem>>, vector<32x1xbf16>
    %cst_82 = arith.constant dense<0.000000e+00> : vector<32x1xf32>
    %146 = tpu.matmul %144, %145, %cst_82 {dimension_numbers = #tpu.dot_dimension_numbers<[1], [0], [0], [1], [0, 0, 1, 1], [], []>} : vector<32x32xbf16>, vector<32x1xbf16>, vector<32x1xf32> -> vector<32x1xf32>
    %c0_83 = arith.constant 0 : index
    %c0_84 = arith.constant 0 : index
    %147 = vector.load %arg25[%c0_83, %c0_84] : memref<1x1xf32, #tpu.memory_space<vmem>>, vector<1x1xf32>
    %148 = vector.broadcast %147 : vector<1x1xf32> to vector<32x1xf32>
    %149 = arith.addf %146, %148 : vector<32x1xf32>
    %cst_85 = arith.constant 0.000000e+00 : f32
    %150 = vector.broadcast %cst_85 : f32 to vector<32x1xf32>
    %151 = tpu.concatenate %149, %72, %83, %150 in 1 : vector<32x1xf32>, vector<32x2xf32>, vector<32x4xf32>, vector<32x1xf32> -> vector<32x8xf32>
    %152 = vector.shape_cast %151 : vector<32x8xf32> to vector<4x8x8xf32>
    %c0_86 = arith.constant 0 : index
    %c0_87 = arith.constant 0 : index
    %c0_88 = arith.constant 0 : index
    %153 = vector.load %arg26[%c0_86, %c0_87, %c0_88] : memref<4x8x8xf32, #tpu.memory_space<vmem>>, vector<4x8x8xf32>
    tpu.vector_store %arg26[%c0_86, %c0_87, %c0_88], %152 {strides = array<i32>} : memref<4x8x8xf32, #tpu.memory_space<vmem>>, vector<4x8x8xf32>,
    return
  }
  func.func @transform_0(%arg0: i32) -> (i32, i32) {
    %c0_i32 = arith.constant 0 : i32
    %c0_i32_0 = arith.constant 0 : i32
    return %arg0, %c0_i32 : i32, i32
  }
  func.func @transform_1(%arg0: i32) -> (i32, i32) {
    %c0_i32 = arith.constant 0 : i32
    %c0_i32_0 = arith.constant 0 : i32
    %c0_i32_1 = arith.constant 0 : i32
    return %c0_i32, %c0_i32_0 : i32, i32
  }
  func.func @transform_2(%arg0: i32) -> (i32, i32) {
    %c0_i32 = arith.constant 0 : i32
    %c0_i32_0 = arith.constant 0 : i32
    %c0_i32_1 = arith.constant 0 : i32
    return %c0_i32, %c0_i32_0 : i32, i32
  }
  func.func @transform_3(%arg0: i32) -> (i32, i32) {
    %c0_i32 = arith.constant 0 : i32
    %c0_i32_0 = arith.constant 0 : i32
    %c0_i32_1 = arith.constant 0 : i32
    return %c0_i32, %c0_i32_0 : i32, i32
  }
  func.func @transform_4(%arg0: i32) -> (i32, i32) {
    %c0_i32 = arith.constant 0 : i32
    %c0_i32_0 = arith.constant 0 : i32
    %c0_i32_1 = arith.constant 0 : i32
    return %c0_i32, %c0_i32_0 : i32, i32
  }
  func.func @transform_5(%arg0: i32) -> (i32, i32) {
    %c0_i32 = arith.constant 0 : i32
    %c0_i32_0 = arith.constant 0 : i32
    %c0_i32_1 = arith.constant 0 : i32
    return %c0_i32, %c0_i32_0 : i32, i32
  }
  func.func @transform_6(%arg0: i32) -> (i32, i32) {
    %c0_i32 = arith.constant 0 : i32
    %c0_i32_0 = arith.constant 0 : i32
    %c0_i32_1 = arith.constant 0 : i32
    return %c0_i32, %c0_i32_0 : i32, i32
  }
  func.func @transform_7(%arg0: i32) -> (i32, i32) {
    %c0_i32 = arith.constant 0 : i32
    %c0_i32_0 = arith.constant 0 : i32
    %c0_i32_1 = arith.constant 0 : i32
    return %c0_i32, %c0_i32_0 : i32, i32
  }
  func.func @transform_8(%arg0: i32) -> (i32, i32) {
    %c0_i32 = arith.constant 0 : i32
    %c0_i32_0 = arith.constant 0 : i32
    %c0_i32_1 = arith.constant 0 : i32
    return %c0_i32, %c0_i32_0 : i32, i32
  }
  func.func @transform_9(%arg0: i32) -> (i32, i32) {
    %c0_i32 = arith.constant 0 : i32
    %c0_i32_0 = arith.constant 0 : i32
    %c0_i32_1 = arith.constant 0 : i32
    return %c0_i32, %c0_i32_0 : i32, i32
  }
  func.func @transform_10(%arg0: i32) -> (i32, i32) {
    %c0_i32 = arith.constant 0 : i32
    %c0_i32_0 = arith.constant 0 : i32
    %c0_i32_1 = arith.constant 0 : i32
    return %c0_i32, %c0_i32_0 : i32, i32
  }
  func.func @transform_11(%arg0: i32) -> (i32, i32) {
    %c0_i32 = arith.constant 0 : i32
    %c0_i32_0 = arith.constant 0 : i32
    %c0_i32_1 = arith.constant 0 : i32
    return %c0_i32, %c0_i32_0 : i32, i32
  }
  func.func @transform_12(%arg0: i32) -> (i32, i32) {
    %c0_i32 = arith.constant 0 : i32
    %c0_i32_0 = arith.constant 0 : i32
    %c0_i32_1 = arith.constant 0 : i32
    return %c0_i32, %c0_i32_0 : i32, i32
  }
  func.func @transform_13(%arg0: i32) -> (i32, i32) {
    %c0_i32 = arith.constant 0 : i32
    %c0_i32_0 = arith.constant 0 : i32
    %c0_i32_1 = arith.constant 0 : i32
    return %c0_i32, %c0_i32_0 : i32, i32
  }
  func.func @transform_14(%arg0: i32) -> (i32, i32) {
    %c0_i32 = arith.constant 0 : i32
    %c0_i32_0 = arith.constant 0 : i32
    %c0_i32_1 = arith.constant 0 : i32
    return %c0_i32, %c0_i32_0 : i32, i32
  }
  func.func @transform_15(%arg0: i32) -> (i32, i32) {
    %c0_i32 = arith.constant 0 : i32
    %c0_i32_0 = arith.constant 0 : i32
    %c0_i32_1 = arith.constant 0 : i32
    return %c0_i32, %c0_i32_0 : i32, i32
  }
  func.func @transform_16(%arg0: i32) -> (i32, i32) {
    %c0_i32 = arith.constant 0 : i32
    %c0_i32_0 = arith.constant 0 : i32
    %c0_i32_1 = arith.constant 0 : i32
    return %c0_i32, %c0_i32_0 : i32, i32
  }
  func.func @transform_17(%arg0: i32) -> (i32, i32) {
    %c0_i32 = arith.constant 0 : i32
    %c0_i32_0 = arith.constant 0 : i32
    %c0_i32_1 = arith.constant 0 : i32
    return %c0_i32, %c0_i32_0 : i32, i32
  }
  func.func @transform_18(%arg0: i32) -> (i32, i32) {
    %c0_i32 = arith.constant 0 : i32
    %c0_i32_0 = arith.constant 0 : i32
    %c0_i32_1 = arith.constant 0 : i32
    return %c0_i32, %c0_i32_0 : i32, i32
  }
  func.func @transform_19(%arg0: i32) -> (i32, i32) {
    %c0_i32 = arith.constant 0 : i32
    %c0_i32_0 = arith.constant 0 : i32
    %c0_i32_1 = arith.constant 0 : i32
    return %c0_i32, %c0_i32_0 : i32, i32
  }
  func.func @transform_20(%arg0: i32) -> (i32, i32) {
    %c0_i32 = arith.constant 0 : i32
    %c0_i32_0 = arith.constant 0 : i32
    %c0_i32_1 = arith.constant 0 : i32
    return %c0_i32, %c0_i32_0 : i32, i32
  }
  func.func @transform_21(%arg0: i32) -> (i32, i32) {
    %c0_i32 = arith.constant 0 : i32
    %c0_i32_0 = arith.constant 0 : i32
    %c0_i32_1 = arith.constant 0 : i32
    return %c0_i32, %c0_i32_0 : i32, i32
  }
  func.func @transform_22(%arg0: i32) -> (i32, i32) {
    %c0_i32 = arith.constant 0 : i32
    %c0_i32_0 = arith.constant 0 : i32
    %c0_i32_1 = arith.constant 0 : i32
    return %c0_i32, %c0_i32_0 : i32, i32
  }
  func.func @transform_23(%arg0: i32) -> (i32, i32) {
    %c0_i32 = arith.constant 0 : i32
    %c0_i32_0 = arith.constant 0 : i32
    %c0_i32_1 = arith.constant 0 : i32
    return %c0_i32, %c0_i32_0 : i32, i32
  }
  func.func @transform_24(%arg0: i32) -> (i32, i32) {
    %c0_i32 = arith.constant 0 : i32
    %c0_i32_0 = arith.constant 0 : i32
    %c0_i32_1 = arith.constant 0 : i32
    return %c0_i32, %c0_i32_0 : i32, i32
  }
  func.func @transform_25(%arg0: i32) -> (i32, i32, i32) {
    %c0_i32 = arith.constant 0 : i32
    %c0_i32_0 = arith.constant 0 : i32
    %c0_i32_1 = arith.constant 0 : i32
    return %arg0, %c0_i32, %c0_i32_0 : i32, i32, i32
  }
}

</mosaic_0001>

<bundles_post_ra>
// kernel: tpu_custom_call.1
= control target key start
LH: loop header
LB: loop body
LE: loop exit
PB: predicated region body
PF: predicated region fallthrough
CT: control target
= control target key end

     0   :  { %s4510_s0 = inlined_call_operand.hbm [shape: f32[4,256], index: 0, kind: input, shape index: {}]   ;;  %s4511_s1 = inlined_call_operand.hbm [shape: f32[8,256], index: 1, kind: input, shape index: {}]   ;;  %s4512_s2 = inlined_call_operand.vmem [shape: bf16[256,256], index: 2, kind: input, shape index: {}]   ;;  %s4513_s3 = inlined_call_operand.hbm [shape: bf16[256,256], index: 3, kind: input, shape index: {}]   ;;  %s4514_s4 = inlined_call_operand.hbm [shape: f32[1,256], index: 4, kind: input, shape index: {}]   ;;  %s4515_s5 = inlined_call_operand.hbm [shape: bf16[256,128], index: 5, kind: input, shape index: {}]   ;;  %s4516_s6 = inlined_call_operand.hbm [shape: f32[1,128], index: 6, kind: input, shape index: {}]   ;;  %s4517_s7 = inlined_call_operand.vmem [shape: bf16[128,64], index: 7, kind: input, shape index: {}]   ;;  %s4518_s8 = inlined_call_operand.hbm [shape: f32[1,64], index: 8, kind: input, shape index: {}]   ;;  %s4519_s9 = inlined_call_operand.vmem [shape: bf16[64,32], index: 9, kind: input, shape index: {}]   ;;  %s4520_s10 = inlined_call_operand.hbm [shape: f32[1,32], index: 10, kind: input, shape index: {}]   ;;  %s4521_s11 = inlined_call_operand.vmem [shape: bf16[32,6], index: 11, kind: input, shape index: {}]   ;;  %s4522_s12 = inlined_call_operand.hbm [shape: f32[1,6], index: 12, kind: input, shape index: {}]   ;;  %s4523_s13 = inlined_call_operand.hbm [shape: bf16[256,256], index: 13, kind: input, shape index: {}]   ;;  %s4524_s14 = inlined_call_operand.hbm [shape: bf16[256,256], index: 14, kind: input, shape index: {}]   ;;  %s4525_s15 = inlined_call_operand.hbm [shape: bf16[4,256], index: 15, kind: input, shape index: {}]   ;;  %s4526_s16 = inlined_call_operand.hbm [shape: f32[1,256], index: 16, kind: input, shape index: {}]   ;;  %s4527_s17 = inlined_call_operand.vmem [shape: bf16[256,128], index: 17, kind: input, shape index: {}]   ;;  %s4528_s18 = inlined_call_operand.hbm [shape: f32[1,128], index: 18, kind: input, shape index: {}]   ;;  %s4529_s19 = inlined_call_operand.vmem [shape: bf16[128,64], index: 19, kind: input, shape index: {}]   ;;  %s4530_s20 = inlined_call_operand.hbm [shape: f32[1,64], index: 20, kind: input, shape index: {}]   ;;  %s4531_s21 = inlined_call_operand.vmem [shape: bf16[64,32], index: 21, kind: input, shape index: {}]   ;;  %s4532_s22 = inlined_call_operand.vmem [shape: f32[1,32], index: 22, kind: input, shape index: {}]   ;;  %s4533_s23 = inlined_call_operand.vmem [shape: bf16[32,1], index: 23, kind: input, shape index: {}]   ;;  %s4534_s24 = inlined_call_operand.<no memory space> [shape: f32[1,1], index: 24, kind: input, shape index: {}]   ;;  %s4535_s25 = inlined_call_operand.hbm [shape: f32[4,8,8], index: 25, kind: output, shape index: {}]  }
   0x1   :  { %4546 = sst [smem:[#allocation37_spill]] %s4510_s0  ;;  %v30_v0 = vstv %s4534_s24 }
   0x2   :  { %4547 = sst [smem:[#allocation38_spill]] %s4511_s1  ;;  %31 = vst [vmem:[#allocation2] sm:$0x1] %v30_v0 }
   0x3   :  { %4548 = sst [smem:[#allocation39_spill]] %s4512_s2 }
   0x4   :  { %4549 = sst [smem:[#allocation40_spill]] %s4513_s3 }
   0x5   :  { %4550 = sst [smem:[#allocation41_spill]] %s4514_s4 }
   0x6   :  { %4551 = sst [smem:[#allocation42_spill]] %s4515_s5 }
   0x7   :  { %4552 = sst [smem:[#allocation43_spill]] %s4516_s6 }
   0x8   :  { %4553 = sst [smem:[#allocation44_spill]] %s4517_s7 }
   0x9   :  { %4554 = sst [smem:[#allocation45_spill]] %s4518_s8 }
   0xa   :  { %4555 = sst [smem:[#allocation46_spill]] %s4519_s9 }
   0xb   :  { %32 = vsyncpa [#allocation4], 0 }
   0xc   :  { %33 = vsyncpa [#allocation7], 0 }
   0xd   :  { %34 = vsyncpa [#allocation10], 0 }
   0xe   :  { %35 = vsyncpa [#allocation13], 0 }
   0xf   :  { %36 = vsyncpa [#allocation16], 0 }
  0x10   :  { %37 = vsyncpa [#allocation19], 0 }
  0x11   :  { %38 = vsyncpa [#allocation22], 0 }
  0x12   :  { %39 = vsyncpa [#allocation25], 0 }
  0x13   :  { %40 = vsyncpa [#allocation5], 0  ;;  %s3788_s6 = smov [#allocation6]   ;;  %s3789_s7 = smov [#allocation9]  }
  0x14   :  { %s57_s30 = sshll.u32 %s3788_s6, 4  ;;  %s81_s3 = sshll.u32 %s3789_s7, 4  ;;  %s58_s30 = int_to_ptr.vmem [resolvable:$true] %s57_s30  ;;  %s82_s3 = int_to_ptr.vmem [resolvable:$true] %s81_s3 }
  0x15   :  { %s4556_s8 = sld [smem:[#allocation38_spill]] }
  0x1b   :  { %s3418_s24 = scalar_lea.hbm %s4556_s8, 256 }
  0x1c   :  { %p3419_p0 = scmp.ne.s32.totalorder %s4556_s8, %s3418_s24  ;;  %p3422_p1 = scmp.lt.u32.totalorder %s3418_s24, %s4556_s8 }
  0x1e   :  { %p3424_p2 = pnand %p3422_p1, %p3419_p0 }
  0x20   :  { %3427 = shalt.err (!%p3424_p2)
}
  0x21   :  { %s3428_s5 = scalar_lea.vmem %s58_s30, 256  ;;  %p3433_p4 = scmp.lt.s32.totalorder %s58_s30, %s58_s30 }
  0x22   :  { %p3429_p3 = scmp.ne.s32.totalorder %s58_s30, %s3428_s5  ;;  %p3434_p5 = scmp.lt.s32.totalorder %s3428_s5, %s3428_s5 }
  0x24   :  { %p3435_p6 = por %p3434_p5, %p3433_p4 }
  0x26   :  { %p3436_p7 = pnand %p3435_p6, %p3429_p3 }
  0x28   :  { %3439 = shalt.err (!%p3436_p7)
}
  0x29   :  { %60 = dma.hbm_to_vmem [thread:$0]  %s4556_s8, 256, %s58_s30, [#allocation7]  }
  0x2a   :  { %s4557_s7 = sld [smem:[#allocation41_spill]] }
  0x30   :  { %s3440_s26 = scalar_lea.hbm %s4557_s7, 32 }
  0x31   :  { %p3441_p8 = scmp.ne.s32.totalorder %s4557_s7, %s3440_s26  ;;  %p3444_p9 = scmp.lt.u32.totalorder %s3440_s26, %s4557_s7 }
  0x33   :  { %p3446_p10 = pnand %p3444_p9, %p3441_p8 }
  0x35   :  { %3449 = shalt.err (!%p3446_p10)
}
  0x36   :  { %s3450_s28 = scalar_lea.vmem %s82_s3, 32  ;;  %p3455_p12 = scmp.lt.s32.totalorder %s82_s3, %s82_s3 }
  0x37   :  { %p3451_p11 = scmp.ne.s32.totalorder %s82_s3, %s3450_s28  ;;  %p3456_p13 = scmp.lt.s32.totalorder %s3450_s28, %s3450_s28 }
  0x39   :  { %p3457_p0 = por %p3456_p13, %p3455_p12 }
  0x3b   :  { %p3458_p1 = pnand %p3457_p0, %p3451_p11 }
  0x3d   :  { %3461 = shalt.err (!%p3458_p1)
}
  0x3e   :  { %84 = dma.hbm_to_vmem [thread:$0]  %s4557_s7, 32, %s82_s3, [#allocation10]  }
  0x3f   :  { %s3790_s9 = smov [#allocation12]   ;;  %s3791_s0 = smov [#allocation15]  }
  0x40   :  { %s103_s5 = sshll.u32 %s3790_s9, 4  ;;  %s127_s29 = sshll.u32 %s3791_s0, 4  ;;  %s104_s5 = int_to_ptr.vmem [resolvable:$true] %s103_s5  ;;  %s128_s29 = int_to_ptr.vmem [resolvable:$true] %s127_s29 }
  0x41   :  { %s4558_s26 = sld [smem:[#allocation43_spill]] }
  0x47   :  { %s3462_s1 = scalar_lea.hbm %s4558_s26, 16 }
  0x48   :  { %p3463_p2 = scmp.ne.s32.totalorder %s4558_s26, %s3462_s1  ;;  %p3466_p3 = scmp.lt.u32.totalorder %s3462_s1, %s4558_s26 }
  0x4a   :  { %p3468_p4 = pnand %p3466_p3, %p3463_p2 }
  0x4c   :  { %3471 = shalt.err (!%p3468_p4)
}
  0x4d   :  { %s3472_s3 = scalar_lea.vmem %s104_s5, 16  ;;  %s3476_s7 = scalar_lea.vmem %s104_s5, 32 }
  0x4e   :  { %p3473_p5 = scmp.ne.s32.totalorder %s104_s5, %s3472_s3  ;;  %p3477_p6 = scmp.lt.s32.totalorder %s104_s5, %s104_s5 }
  0x4f   :  { %p3478_p7 = scmp.lt.s32.totalorder %s3476_s7, %s3472_s3 }
  0x51   :  { %p3479_p8 = por %p3478_p7, %p3477_p6 }
  0x53   :  { %p3480_p9 = pnand %p3479_p8, %p3473_p5 }
  0x55   :  { %3483 = shalt.err (!%p3480_p9)
}
  0x56   :  { %106 = dma.hbm_to_vmem [thread:$0]  %s4558_s26, 16, %s104_s5, [#allocation13]  }
  0x57   :  { %s3484_s2 = scalar_lea.hbm %s4520_s10, 16 }
  0x58   :  { %p3485_p10 = scmp.ne.s32.totalorder %s4520_s10, %s3484_s2  ;;  %p3488_p11 = scmp.lt.u32.totalorder %s3484_s2, %s4520_s10 }
  0x5a   :  { %p3490_p12 = pnand %p3488_p11, %p3485_p10 }
  0x5c   :  { %3493 = shalt.err (!%p3490_p12)
}
  0x5d   :  { %s3494_s4 = scalar_lea.vmem %s128_s29, 16  ;;  %s3498_s28 = scalar_lea.vmem %s128_s29, 32 }
  0x5e   :  { %p3495_p13 = scmp.ne.s32.totalorder %s128_s29, %s3494_s4  ;;  %p3499_p0 = scmp.lt.s32.totalorder %s128_s29, %s128_s29 }
  0x5f   :  { %p3500_p1 = scmp.lt.s32.totalorder %s3498_s28, %s3494_s4 }
  0x61   :  { %p3501_p2 = por %p3500_p1, %p3499_p0 }
  0x63   :  { %p3502_p3 = pnand %p3501_p2, %p3495_p13 }
  0x65   :  { %3505 = shalt.err (!%p3502_p3)
}
  0x66   :  { %130 = dma.hbm_to_vmem [thread:$0]  %s4520_s10, 16, %s128_s29, [#allocation16]  }
  0x67   :  { %s3792_s3 = smov [#allocation18]   ;;  %s3793_s30 = smov [#allocation21]  }
  0x68   :  { %s148_s7 = sshll.u32 %s3792_s3, 4  ;;  %s173_s8 = sshll.u32 %s3793_s30, 4  ;;  %s149_s7 = int_to_ptr.vmem [resolvable:$true] %s148_s7  ;;  %s174_s8 = int_to_ptr.vmem [resolvable:$true] %s173_s8 }
  0x69   :  { %s3506_s2 = scalar_lea.hbm %s4523_s13, 4096 }
  0x6a   :  { %p3507_p4 = scmp.ne.s32.totalorder %s4523_s13, %s3506_s2  ;;  %p3510_p5 = scmp.lt.u32.totalorder %s3506_s2, %s4523_s13 }
  0x6c   :  { %p3512_p6 = pnand %p3510_p5, %p3507_p4 }
  0x6e   :  { %3515 = shalt.err (!%p3512_p6)
}
  0x6f   :  { %s3516_s10 = scalar_lea.vmem %s149_s7, 4096  ;;  %p3521_p8 = scmp.lt.s32.totalorder %s149_s7, %s149_s7 }
  0x70   :  { %p3517_p7 = scmp.ne.s32.totalorder %s149_s7, %s3516_s10  ;;  %p3522_p9 = scmp.lt.s32.totalorder %s3516_s10, %s3516_s10 }
  0x72   :  { %p3523_p10 = por %p3522_p9, %p3521_p8 }
  0x74   :  { %p3524_p11 = pnand %p3523_p10, %p3517_p7 }
  0x76   :  { %3527 = shalt.err (!%p3524_p11)
}
  0x77   :  { %s3794_s29 = smov 128   ;;  %s3795_s4 = smov 8  }
  0x78   :  { %154 = dma.hbm_to_vmem [thread:$0]  %s4523_s13, 4096, %s149_s7, [#allocation19], %s3794_s29, %s3794_s29, %s3795_s4  }
  0x79   :  { %s3528_s30 = scalar_lea.hbm %s4525_s15, 64 }
  0x7a   :  { %p3529_p12 = scmp.ne.s32.totalorder %s4525_s15, %s3528_s30  ;;  %p3532_p13 = scmp.lt.u32.totalorder %s3528_s30, %s4525_s15 }
  0x7c   :  { %p3534_p0 = pnand %p3532_p13, %p3529_p12 }
  0x7e   :  { %3537 = shalt.err (!%p3534_p0)
}
  0x7f   :  { %s3538_s1 = scalar_lea.vmem %s174_s8, 64  ;;  %p3543_p2 = scmp.lt.s32.totalorder %s174_s8, %s174_s8 }
  0x80   :  { %p3539_p1 = scmp.ne.s32.totalorder %s174_s8, %s3538_s1  ;;  %p3544_p3 = scmp.lt.s32.totalorder %s3538_s1, %s3538_s1 }
  0x82   :  { %p3545_p4 = por %p3544_p3, %p3543_p2 }
  0x84   :  { %p3546_p5 = pnand %p3545_p4, %p3539_p1 }
  0x86   :  { %3549 = shalt.err (!%p3546_p5)
}
  0x87   :  { %176 = dma.hbm_to_vmem [thread:$0]  %s4525_s15, 64, %s174_s8, [#allocation22]  }
  0x88   :  { %s3796_s27 = smov [#allocation24]   ;;  %s3797_s10 = smov [#allocation3]  }
  0x89   :  { %s195_s24 = sshll.u32 %s3796_s27, 4  ;;  %s47_s28 = sshll.u32 %s3797_s10, 4  ;;  %s196_s24 = int_to_ptr.vmem [resolvable:$true] %s195_s24  ;;  %s48_s28 = int_to_ptr.vmem [resolvable:$true] %s47_s28 }
  0x8a   :  { %s3550_s3 = scalar_lea.hbm %s4528_s18, 16 }
  0x8b   :  { %p3551_p6 = scmp.ne.s32.totalorder %s4528_s18, %s3550_s3  ;;  %p3554_p7 = scmp.lt.u32.totalorder %s3550_s3, %s4528_s18 }
  0x8d   :  { %p3556_p8 = pnand %p3554_p7, %p3551_p6 }
  0x8f   :  { %3559 = shalt.err (!%p3556_p8)
}
  0x90   :  { %s3560_s15 = scalar_lea.vmem %s196_s24, 16  ;;  %s3564_s8 = scalar_lea.vmem %s196_s24, 32 }
  0x91   :  { %p3561_p9 = scmp.ne.s32.totalorder %s196_s24, %s3560_s15  ;;  %p3565_p10 = scmp.lt.s32.totalorder %s196_s24, %s196_s24 }
  0x92   :  { %p3566_p11 = scmp.lt.s32.totalorder %s3564_s8, %s3560_s15 }
  0x94   :  { %p3567_p12 = por %p3566_p11, %p3565_p10 }
  0x96   :  { %p3568_p13 = pnand %p3567_p12, %p3561_p9 }
  0x98   :  { %3571 = shalt.err (!%p3568_p13)
}
  0x99   :  { %198 = dma.hbm_to_vmem [thread:$0]  %s4528_s18, 16, %s196_s24, [#allocation25]  }
  0x9a   :  { %s4559_s27 = sld [smem:[#allocation37_spill]] }
  0xa0   :  { %s3572_s10 = scalar_lea.hbm %s4559_s27, 128 }
  0xa1   :  { %p3573_p0 = scmp.ne.s32.totalorder %s4559_s27, %s3572_s10  ;;  %p3576_p1 = scmp.lt.u32.totalorder %s3572_s10, %s4559_s27 }
  0xa3   :  { %p3578_p2 = pnand %p3576_p1, %p3573_p0 }
  0xa5   :  { %3581 = shalt.err (!%p3578_p2)
}
  0xa6   :  { %s3582_s9 = scalar_lea.vmem %s48_s28, 128  ;;  %p3587_p4 = scmp.lt.s32.totalorder %s48_s28, %s48_s28 }
  0xa7   :  { %p3583_p3 = scmp.ne.s32.totalorder %s48_s28, %s3582_s9  ;;  %p3588_p5 = scmp.lt.s32.totalorder %s3582_s9, %s3582_s9 }
  0xa9   :  { %p3589_p6 = por %p3588_p5, %p3587_p4 }
  0xab   :  { %p3590_p7 = pnand %p3589_p6, %p3583_p3 }
  0xad   :  { %3593 = shalt.err (!%p3590_p7)
}
  0xae   :  { %50 = dma.hbm_to_vmem [thread:$0]  %s4559_s27, 128, %s48_s28, [#allocation4]  }
  0xaf   :  { %s3798_s0 = smov [#allocation8]   ;;  %s3799_s15 = smov [#allocation11]  }
  0xb0   :  { %s68_s2 = sshll.u32 %s3798_s0, 4  ;;  %s90_s8 = sshll.u32 %s3799_s15, 4  ;;  %s69_s2 = int_to_ptr.vmem [resolvable:$true] %s68_s2  ;;  %s4044_s8 = int_to_ptr.vmem [resolvable:$true] %s90_s8 }
  0xb1   :  { %s4560_s13 = sld [smem:[#allocation40_spill]] }
  0xb7   :  { %s3594_s7 = scalar_lea.hbm %s4560_s13, 4096 }
  0xb8   :  { %p3595_p8 = scmp.ne.s32.totalorder %s4560_s13, %s3594_s7  ;;  %p3598_p9 = scmp.lt.u32.totalorder %s3594_s7, %s4560_s13 }
  0xba   :  { %p3600_p10 = pnand %p3598_p9, %p3595_p8 }
  0xbc   :  { %3603 = shalt.err (!%p3600_p10)
}
  0xbd   :  { %s3604_s28 = scalar_lea.vmem %s69_s2, 4096  ;;  %p3609_p12 = scmp.lt.s32.totalorder %s69_s2, %s69_s2 }
  0xbe   :  { %p3605_p11 = scmp.ne.s32.totalorder %s69_s2, %s3604_s28  ;;  %p3610_p13 = scmp.lt.s32.totalorder %s3604_s28, %s3604_s28 }
  0xc0   :  { %p3611_p0 = por %p3610_p13, %p3609_p12 }
  0xc2   :  { %p3612_p1 = pnand %p3611_p0, %p3605_p11 }
  0xc4   :  { %3615 = shalt.err (!%p3612_p1)
}
  0xc5   :  { %74 = dma.hbm_to_vmem [thread:$0]  %s4560_s13, 4096, %s69_s2, [#allocation7], %s3794_s29, %s3794_s29, %s3795_s4  }
  0xc6   :  { %s4561_s24 = sld [smem:[#allocation42_spill]] }
  0xcc   :  { %s3616_s0 = scalar_lea.hbm %s4561_s24, 2048 }
  0xcd   :  { %p3617_p2 = scmp.ne.s32.totalorder %s4561_s24, %s3616_s0  ;;  %p3620_p3 = scmp.lt.u32.totalorder %s3616_s0, %s4561_s24 }
  0xcf   :  { %p3622_p4 = pnand %p3620_p3, %p3617_p2 }
  0xd1   :  { %3625 = shalt.err (!%p3622_p4)
}
  0xd2   :  { %s3626_s10 = scalar_lea.vmem %s4044_s8, 2048  ;;  %p3631_p6 = scmp.lt.s32.totalorder %s4044_s8, %s4044_s8 }
  0xd3   :  { %p3627_p5 = scmp.ne.s32.totalorder %s4044_s8, %s3626_s10  ;;  %p3632_p7 = scmp.lt.s32.totalorder %s3626_s10, %s3626_s10 }
  0xd5   :  { %p3633_p8 = por %p3632_p7, %p3631_p6 }
  0xd7   :  { %p3634_p9 = pnand %p3633_p8, %p3627_p5 }
  0xd9   :  { %3637 = shalt.err (!%p3634_p9)
}
  0xda   :  { %s3800_s2 = smov 64   ;;  %s3801_s13 = smov 4  }
  0xdb   :  { %96 = dma.hbm_to_vmem [thread:$0]  %s4561_s24, 2048, %s4044_s8, [#allocation10], %s3800_s2, %s3800_s2, %s3801_s13  }
  0xdc   :  { %s3802_s3 = smov [#allocation14]   ;;  %s3803_s27 = smov [#allocation17]  }
  0xdd   :  { %s115_s28 = sshll.u32 %s3802_s3, 4  ;;  %s139_s30 = sshll.u32 %s3803_s27, 4  ;;  %s116_s28 = int_to_ptr.vmem [resolvable:$true] %s115_s28  ;;  %s140_s30 = int_to_ptr.vmem [resolvable:$true] %s139_s30 }
  0xde   :  { %s4562_s0 = sld [smem:[#allocation45_spill]] }
  0xe4   :  { %s3638_s15 = scalar_lea.hbm %s4562_s0, 16 }
  0xe5   :  { %p3639_p10 = scmp.ne.s32.totalorder %s4562_s0, %s3638_s15  ;;  %p3642_p11 = scmp.lt.u32.totalorder %s3638_s15, %s4562_s0 }
  0xe7   :  { %p3644_p12 = pnand %p3642_p11, %p3639_p10 }
  0xe9   :  { %3647 = shalt.err (!%p3644_p12)
}
  0xea   :  { %s3648_s8 = scalar_lea.vmem %s116_s28, 16  ;;  %s3652_s24 = scalar_lea.vmem %s116_s28, 32 }
  0xeb   :  { %p3649_p13 = scmp.ne.s32.totalorder %s116_s28, %s3648_s8  ;;  %p3653_p0 = scmp.lt.s32.totalorder %s116_s28, %s116_s28 }
  0xec   :  { %p3654_p1 = scmp.lt.s32.totalorder %s3652_s24, %s3648_s8 }
  0xee   :  { %p3655_p2 = por %p3654_p1, %p3653_p0 }
  0xf0   :  { %p3656_p3 = pnand %p3655_p2, %p3649_p13 }
  0xf2   :  { %3659 = shalt.err (!%p3656_p3)
}
  0xf3   :  { %118 = dma.hbm_to_vmem [thread:$0]  %s4562_s0, 16, %s116_s28, [#allocation13]  }
  0xf4   :  { %s3660_s3 = scalar_lea.hbm %s4522_s12, 16 }
  0xf5   :  { %p3661_p4 = scmp.ne.s32.totalorder %s4522_s12, %s3660_s3  ;;  %p3664_p5 = scmp.lt.u32.totalorder %s3660_s3, %s4522_s12 }
  0xf7   :  { %p3666_p6 = pnand %p3664_p5, %p3661_p4 }
  0xf9   :  { %3669 = shalt.err (!%p3666_p6)
}
  0xfa   :  { %s3670_s6 = scalar_lea.vmem %s140_s30, 16  ;;  %s3674_s1 = scalar_lea.vmem %s140_s30, 32 }
  0xfb   :  { %p3671_p7 = scmp.ne.s32.totalorder %s140_s30, %s3670_s6  ;;  %p3675_p8 = scmp.lt.s32.totalorder %s140_s30, %s140_s30 }
  0xfc   :  { %p3676_p9 = scmp.lt.s32.totalorder %s3674_s1, %s3670_s6 }
  0xfe   :  { %p3677_p10 = por %p3676_p9, %p3675_p8 }
 0x100   :  { %p3678_p11 = pnand %p3677_p10, %p3671_p7 }
 0x102   :  { %3681 = shalt.err (!%p3678_p11)
}
 0x103   :  { %142 = dma.hbm_to_vmem [thread:$0]  %s4522_s12, 16, %s140_s30, [#allocation16]  }
 0x104   :  { %s3804_s7 = smov [#allocation20]   ;;  %s3805_s8 = smov [#allocation23]  }
 0x105   :  { %s160_s10 = sshll.u32 %s3804_s7, 4  ;;  %s183_s24 = sshll.u32 %s3805_s8, 4  ;;  %s161_s10 = int_to_ptr.vmem [resolvable:$true] %s160_s10  ;;  %s184_s24 = int_to_ptr.vmem [resolvable:$true] %s183_s24 }
 0x106   :  { %s3682_s5 = scalar_lea.hbm %s4524_s14, 4096 }
 0x107   :  { %p3683_p12 = scmp.ne.s32.totalorder %s4524_s14, %s3682_s5  ;;  %p3686_p13 = scmp.lt.u32.totalorder %s3682_s5, %s4524_s14 }
 0x109   :  { %p3688_p0 = pnand %p3686_p13, %p3683_p12 }
 0x10b   :  { %3691 = shalt.err (!%p3688_p0)
}
 0x10c   :  { %s3692_s12 = scalar_lea.vmem %s161_s10, 4096  ;;  %p3697_p2 = scmp.lt.s32.totalorder %s161_s10, %s161_s10 }
 0x10d   :  { %p3693_p1 = scmp.ne.s32.totalorder %s161_s10, %s3692_s12  ;;  %p3698_p3 = scmp.lt.s32.totalorder %s3692_s12, %s3692_s12 }
 0x10f   :  { %p3699_p4 = por %p3698_p3, %p3697_p2 }
 0x111   :  { %p3700_p5 = pnand %p3699_p4, %p3693_p1 }
 0x113   :  { %3703 = shalt.err (!%p3700_p5)
}
 0x114   :  { %166 = dma.hbm_to_vmem [thread:$0]  %s4524_s14, 4096, %s161_s10, [#allocation19], %s3794_s29, %s3794_s29, %s3795_s4  }
 0x115   :  { %s3704_s1 = scalar_lea.hbm %s4526_s16, 32 }
 0x116   :  { %p3705_p6 = scmp.ne.s32.totalorder %s4526_s16, %s3704_s1  ;;  %p3708_p7 = scmp.lt.u32.totalorder %s3704_s1, %s4526_s16 }
 0x118   :  { %p3710_p8 = pnand %p3708_p7, %p3705_p6 }
 0x11a   :  { %3713 = shalt.err (!%p3710_p8)
}
 0x11b   :  { %s3714_s2 = scalar_lea.vmem %s184_s24, 32  ;;  %p3719_p10 = scmp.lt.s32.totalorder %s184_s24, %s184_s24 }
 0x11c   :  { %p3715_p9 = scmp.ne.s32.totalorder %s184_s24, %s3714_s2  ;;  %p3720_p11 = scmp.lt.s32.totalorder %s3714_s2, %s3714_s2 }
 0x11e   :  { %p3721_p12 = por %p3720_p11, %p3719_p10 }
 0x120   :  { %p3722_p13 = pnand %p3721_p12, %p3715_p9 }
 0x122   :  { %3725 = shalt.err (!%p3722_p13)
}
 0x123   :  { %186 = dma.hbm_to_vmem [thread:$0]  %s4526_s16, 32, %s184_s24, [#allocation22]  }
 0x124   :  { %s3806_s13 = smov [#allocation26]   ;;  %s3726_s27 = scalar_lea.hbm %s4530_s20, 16 }
 0x125   :  { %s207_s5 = sshll.u32 %s3806_s13, 4  ;;  %p3727_p0 = scmp.ne.s32.totalorder %s4530_s20, %s3726_s27  ;;  %s208_s5 = int_to_ptr.vmem [resolvable:$true] %s207_s5 }
 0x126   :  { %p3730_p1 = scmp.lt.u32.totalorder %s3726_s27, %s4530_s20 }
 0x128   :  { %p3732_p2 = pnand %p3730_p1, %p3727_p0 }
 0x12a   :  { %3735 = shalt.err (!%p3732_p2)
}
 0x12b   :  { %s3736_s15 = scalar_lea.vmem %s208_s5, 16  ;;  %s3740_s16 = scalar_lea.vmem %s208_s5, 32 }
 0x12c   :  { %p3737_p3 = scmp.ne.s32.totalorder %s208_s5, %s3736_s15  ;;  %p3741_p4 = scmp.lt.s32.totalorder %s208_s5, %s208_s5 }
 0x12d   :  { %p3742_p5 = scmp.lt.s32.totalorder %s3740_s16, %s3736_s15 }
 0x12f   :  { %p3743_p6 = por %p3742_p5, %p3741_p4 }
 0x131   :  { %p3744_p7 = pnand %p3743_p6, %p3737_p3 }
 0x133   :  { %3747 = shalt.err (!%p3744_p7)
}
 0x134   :  { %210 = dma.hbm_to_vmem [thread:$0]  %s4530_s20, 16, %s208_s5, [#allocation25]  }
 0x135   :  { %3770 = dma.done.wait [#allocation4], 128  }
 0x136   :  { %3771 = vsyncadd [#allocation4], 4294967168 }
 0x137   :  { %3772 = dma.done.wait [#allocation7], 4352  }
 0x138   :  { %3773 = vsyncadd [#allocation7], 4294962944 }
 0x139   :  { %3774 = dma.done.wait [#allocation10], 2080  }
 0x13a   :  { %3775 = vsyncadd [#allocation10], 4294965216 }
 0x13b   :  { %3776 = dma.done.wait [#allocation13], 32  }
 0x13c   :  { %3777 = vsyncadd [#allocation13], 4294967264 }
 0x13d   :  { %3778 = dma.done.wait [#allocation16], 32  }
 0x13e   :  { %3779 = vsyncadd [#allocation16], 4294967264 }
 0x13f   :  { %3780 = dma.done.wait [#allocation19], 8192  }
 0x140   :  { %3781 = vsyncadd [#allocation19], 4294959104 }
 0x141   :  { %3782 = dma.done.wait [#allocation22], 96  }
 0x142   :  { %3783 = vsyncadd [#allocation22], 4294967200 }
 0x143   :  { %3784 = dma.done.wait [#allocation25], 32  }
 0x144   :  { %3785 = vsyncadd [#allocation25], 4294967264  ;;  %s4563_s0 = sld [smem:[#allocation39_spill]]  ;;  %v3156_v5 = vld [vmem:[#allocation8 + $0x4] ss:$8 sps:$4 sm:$0xff]   ;;  %v270_v52 = vld [vmem:[#allocation6 + $0x8] sm:$0xff] }
 0x145   :  { %v3160_v7 = vld [vmem:[#allocation8] ss:$8 sps:$4 sm:$0xff]   ;;  %709 = vmatprep.subr.bf16.mxu1 %v3156_v5  ;;  %v3162_v8 = vld [vmem:[#allocation8 + $0x14] ss:$8 sps:$4 sm:$0xff]   ;;  %v3166_v11 = vld [vmem:[#allocation8 + $0x10] ss:$8 sps:$4 sm:$0xff]  }
 0x146   :  { %710 = vmatpush1.bf16.msra.mxu1 %v3160_v7  ;;  %v3168_v12 = vld [vmem:[#allocation8 + $0x24] ss:$8 sps:$4 sm:$0xff]   ;;  %v3172_v14 = vld [vmem:[#allocation8 + $0x20] ss:$8 sps:$4 sm:$0xff]   ;;  %v3174_v15 = vld [vmem:[#allocation8 + $0x34] ss:$8 sps:$4 sm:$0xff]  }
 0x147   :  { %711 = vmatprep.subr.bf16.mxu1 %v3162_v8  ;;  %v3178_v17 = vld [vmem:[#allocation8 + $0x30] ss:$8 sps:$4 sm:$0xff]   ;;  %v3180_v19 = vld [vmem:[#allocation8 + $0x44] ss:$8 sps:$4 sm:$0xff]   ;;  %v3184_v22 = vld [vmem:[#allocation8 + $0x40] ss:$8 sps:$4 sm:$0xff]  }
 0x148   :  { %v3186_v23 = vld [vmem:[#allocation8 + $0x54] ss:$8 sps:$4 sm:$0xff]   ;;  %v3190_v25 = vld [vmem:[#allocation8 + $0x50] ss:$8 sps:$4 sm:$0xff]   ;;  %v3192_v27 = vld [vmem:[#allocation8 + $0x64] ss:$8 sps:$4 sm:$0xff]  }
 0x149   :  { %v3196_v30 = vld [vmem:[#allocation8 + $0x60] ss:$8 sps:$4 sm:$0xff]   ;;  %v3198_v31 = vld [vmem:[#allocation8 + $0x74] ss:$8 sps:$4 sm:$0xff]   ;;  %v3202_v33 = vld [vmem:[#allocation8 + $0x70] ss:$8 sps:$4 sm:$0xff]  }
 0x14a   :  { %v3150_v1 = vld [vmem:[%s4563_s0 + $0x4] ss:$8 sps:$4 sm:$0xff]   ;;  %v3152_v2 = vld [vmem:[%s4563_s0] ss:$8 sps:$4 sm:$0xff]   ;;  %v3153_v3 = vld [vmem:[%s4563_s0 + $0x14] ss:$8 sps:$4 sm:$0xff]   ;;  %712 = vmatpush1.bf16.msra.mxu1 %v3166_v11 }
 0x14b   :  { %476 = vmatprep.subr.bf16.mxu0 %v3150_v1  ;;  %v3155_v4 = vld [vmem:[%s4563_s0 + $0x10] ss:$8 sps:$4 sm:$0xff]   ;;  %v3158_v6 = vld [vmem:[%s4563_s0 + $0x24] ss:$8 sps:$4 sm:$0xff]   ;;  %v3161_v9 = vld [vmem:[%s4563_s0 + $0x20] ss:$8 sps:$4 sm:$0xff]   ;;  %713 = vmatprep.subr.bf16.mxu1 %v3168_v12 }
 0x14c   :  { %477 = vmatpush1.bf16.msra.mxu0 %v3152_v2  ;;  %v3164_v10 = vld [vmem:[%s4563_s0 + $0x34] ss:$8 sps:$4 sm:$0xff]   ;;  %v3167_v13 = vld [vmem:[%s4563_s0 + $0x30] ss:$8 sps:$4 sm:$0xff]   ;;  %v3170_v16 = vld [vmem:[%s4563_s0 + $0x44] ss:$8 sps:$4 sm:$0xff]  }
 0x14d   :  { %478 = vmatprep.subr.bf16.mxu0 %v3153_v3  ;;  %v3173_v18 = vld [vmem:[%s4563_s0 + $0x40] ss:$8 sps:$4 sm:$0xff]   ;;  %v3176_v20 = vld [vmem:[%s4563_s0 + $0x54] ss:$8 sps:$4 sm:$0xff]   ;;  %v3179_v21 = vld [vmem:[%s4563_s0 + $0x50] ss:$8 sps:$4 sm:$0xff]  }
 0x14e   :  { %714 = vmatpush1.bf16.msra.mxu1 %v3172_v14  ;;  %v3182_v24 = vld [vmem:[%s4563_s0 + $0x64] ss:$8 sps:$4 sm:$0xff]   ;;  %v3185_v26 = vld [vmem:[%s4563_s0 + $0x60] ss:$8 sps:$4 sm:$0xff]   ;;  %v3188_v28 = vld [vmem:[%s4563_s0 + $0x74] ss:$8 sps:$4 sm:$0xff]  }
 0x14f   :  { %715 = vmatprep.subr.bf16.mxu1 %v3174_v15  ;;  %v3191_v29 = vld [vmem:[%s4563_s0 + $0x70] ss:$8 sps:$4 sm:$0xff]   ;;  %v3194_v32 = vld [vmem:[%s4563_s0 + $0x84] ss:$8 sps:$4 sm:$0xff]   ;;  %v3197_v34 = vld [vmem:[%s4563_s0 + $0x80] ss:$8 sps:$4 sm:$0xff]  }
 0x150   :  { %479 = vmatpush1.bf16.msra.mxu0 %v3155_v4  ;;  %v3204_v35 = vld [vmem:[#allocation8 + $0x84] ss:$8 sps:$4 sm:$0xff]   ;;  %v3203_v37 = vld [vmem:[%s4563_s0 + $0x90] ss:$8 sps:$4 sm:$0xff]   ;;  %vm272_vm1 = vcmp.ge.f32.partialorder %v270_v52, 0.0  ;;  %s4564_s20 = sld [smem:[#allocation44_spill]] }
 0x151   :  { %480 = vmatprep.subr.bf16.mxu0 %v3158_v6  ;;  %v3200_v36 = vld [vmem:[%s4563_s0 + $0x94] ss:$8 sps:$4 sm:$0xff]   ;;  %v3206_v40 = vld [vmem:[%s4563_s0 + $0xa4] ss:$8 sps:$4 sm:$0xff]   ;;  %v3209_v42 = vld [vmem:[%s4563_s0 + $0xa0] ss:$8 sps:$4 sm:$0xff]  }
 0x152   :  { %716 = vmatpush1.bf16.msra.mxu1 %v3178_v17  ;;  %v3208_v38 = vld [vmem:[#allocation8 + $0x80] ss:$8 sps:$4 sm:$0xff]   ;;  %v3210_v39 = vld [vmem:[#allocation8 + $0x94] ss:$8 sps:$4 sm:$0xff]   ;;  %v3214_v41 = vld [vmem:[#allocation8 + $0x90] ss:$8 sps:$4 sm:$0xff]  }
 0x153   :  { %717 = vmatprep.subr.bf16.mxu1 %v3180_v19  ;;  %v3212_v43 = vld [vmem:[%s4563_s0 + $0xb4] ss:$8 sps:$4 sm:$0xff]   ;;  %v265_v45 = vld [vmem:[#allocation3] sm:$0xff]  ;;  %v3215_v47 = vld [vmem:[%s4563_s0 + $0xb0] ss:$8 sps:$4 sm:$0xff]   ;;  %s4565_s24 = sld [smem:[#allocation46_spill]] }
 0x154   :  { %481 = vmatpush1.bf16.msra.mxu0 %v3161_v9  ;;  %v3216_v44 = vld [vmem:[#allocation8 + $0xa4] ss:$8 sps:$4 sm:$0xff]   ;;  %vm266_vm0 = vcmp.ge.f32.partialorder %v265_v45, 0.0  ;;  %v267_v46 = vmul.f32 0.01, %v265_v45  ;;  %v269_v62 = vld [vmem:[#allocation6] sm:$0xff] }
 0x155   :  { %482 = vmatprep.subr.bf16.mxu0 %v3164_v10  ;;  %v3220_v48 = vld [vmem:[#allocation8 + $0xa0] ss:$8 sps:$4 sm:$0xff]   ;;  %v3222_v50 = vld [vmem:[#allocation8 + $0xb4] ss:$8 sps:$4 sm:$0xff]   ;;  %v274_v54 = vmul.f32 0.01, %v270_v52 }
 0x156   :  { %718 = vmatpush1.bf16.msra.mxu1 %v3184_v22  ;;  %v3218_v49 = vld [vmem:[%s4563_s0 + $0xc4] ss:$8 sps:$4 sm:$0xff]   ;;  %v268_v51 = vsel %vm266_vm0, %v265_v45, %v267_v46  ;;  %v3221_v55 = vld [vmem:[%s4563_s0 + $0xc0] ss:$8 sps:$4 sm:$0xff]   ;;  %v3224_v58 = vld [vmem:[%s4563_s0 + $0xd4] ss:$8 sps:$4 sm:$0xff]  }
 0x157   :  { %719 = vmatprep.subr.bf16.mxu1 %v3186_v23  ;;  %v278_v53 = vcombine.high %v268_v51, %v268_v51  ;;  %v3226_v56 = vld [vmem:[#allocation8 + $0xb0] ss:$8 sps:$4 sm:$0xff]   ;;  %v3228_v57 = vld [vmem:[#allocation8 + $0xc4] ss:$8 sps:$4 sm:$0xff]   ;;  %v276_v60 = vsel %vm272_vm1, %v270_v52, %v274_v54  ;;  %v3232_v63 = vld [vmem:[#allocation8 + $0xc0] ss:$8 sps:$4 sm:$0xff]   ;;  %v4243_v14 = vpack.c.bf16 %v268_v51, %v268_v51 }
 0x158   :  { %483 = vmatpush1.bf16.msra.mxu0 %v3167_v13  ;;  %v4224_v61 = vpack.c.bf16 %v276_v60, %v276_v60  ;;  %v3227_v0 = vld [vmem:[%s4563_s0 + $0xd0] ss:$8 sps:$4 sm:$0xff]   ;;  %v3230_v2 = vld [vmem:[%s4563_s0 + $0xe4] ss:$8 sps:$4 sm:$0xff]   ;;  %v273_v3 = vmul.f32 0.01, %v269_v62 }
 0x159   :  { %484 = vmatprep.subr.bf16.mxu0 %v3170_v16  ;;  %v4222_v59 = vpack.c.bf16 %v278_v53, %v278_v53  ;;  %v3234_v1 = vld [vmem:[#allocation8 + $0xd4] ss:$8 sps:$4 sm:$0xff]   ;;  %vm271_vm2 = vcmp.ge.f32.partialorder %v269_v62, 0.0  ;;  %v3238_v4 = vld [vmem:[#allocation8 + $0xd0] ss:$8 sps:$4 sm:$0xff]   ;;  %v3246_v11 = vld [vmem:[#allocation11 + $0x40] sm:$0xff]  }
 0x15a   :  { %720 = vmatpush1.bf16.msra.mxu1 %v3190_v25  ;;  %741 = vmatprep.mubr.bf16.mxu1 %v4224_v61  ;;  %v3233_v5 = vld [vmem:[%s4563_s0 + $0xe0] ss:$8 sps:$4 sm:$0xff]   ;;  %v3236_v7 = vld [vmem:[%s4563_s0 + $0xf4] ss:$8 sps:$4 sm:$0xff]   ;;  %v3239_v9 = vld [vmem:[%s4563_s0 + $0xf0] ss:$8 sps:$4 sm:$0xff]   ;;  %v275_v15 = vsel %vm271_vm2, %v269_v62, %v273_v3 }
 0x15b   :  { %721 = vmatprep.subr.bf16.mxu1 %v3192_v27  ;;  %508 = vmatprep.mubr.bf16.mxu0 %v4222_v59  ;;  %v3240_v6 = vld [vmem:[#allocation8 + $0xe4] ss:$8 sps:$4 sm:$0xff]   ;;  %v3242_v8 = vld [vmem:[#allocation8 + $0xe0] ss:$8 sps:$4 sm:$0xff]   ;;  %v3243_v10 = vld [vmem:[#allocation8 + $0xf4] ss:$8 sps:$4 sm:$0xff]   ;;  %v4246_v17 = vpack.c.bf16 %v275_v15, %v275_v15 }
 0x15c   :  { %485 = vmatpush1.bf16.msra.mxu0 %v3173_v18  ;;  %v3245_v12 = vld [vmem:[#allocation8 + $0xf0] ss:$8 sps:$4 sm:$0xff]   ;;  %v3247_v13 = vld [vmem:[#allocation11] sm:$0xff]   ;;  %s3810_s13 = smov 1  }
 0x15d   :  { %486 = vmatprep.subr.bf16.mxu0 %v3176_v20  ;;  %v3248_v16 = vld [vmem:[#allocation11 + $0x48] sm:$0xff]   ;;  %v3250_v19 = vld [vmem:[#allocation11 + $0x50] sm:$0xff]   ;;  %v3253_v22 = vld [vmem:[#allocation11 + $0x18] sm:$0xff]  }
 0x15e   :  { %722 = vmatpush1.bf16.msra.mxu1 %v3196_v30  ;;  %v3249_v18 = vld [vmem:[#allocation11 + $0x8] sm:$0xff]   ;;  %v3251_v20 = vld [vmem:[#allocation11 + $0x10] sm:$0xff]   ;;  %v3254_v23 = vld [vmem:[#allocation11 + $0x60] sm:$0xff]  }
 0x15f   :  { %723 = vmatprep.subr.bf16.mxu1 %v3198_v31  ;;  %v3256_v25 = vld [vmem:[#allocation11 + $0x68] sm:$0xff]   ;;  %v3258_v27 = vld [vmem:[#allocation11 + $0x70] sm:$0xff]   ;;  %v3261_v30 = vld [vmem:[#allocation11 + $0x38] sm:$0xff]  }
 0x160   :  { %487 = vmatpush1.bf16.msra.mxu0 %v3179_v21  ;;  %v3252_v21 = vld [vmem:[#allocation11 + $0x58] sm:$0xff]   ;;  %v3262_v31 = vld [vmem:[%s4564_s20] sm:$0xff]  }
 0x161   :  { %488 = vmatprep.subr.bf16.mxu0 %v3182_v24  ;;  %v3255_v24 = vld [vmem:[#allocation11 + $0x20] sm:$0xff]  }
 0x162   :  { %724 = vmatpush1.bf16.msra.mxu1 %v3202_v33  ;;  %v3264_v33 = vld [vmem:[%s4564_s20 + $0x10] sm:$0xff]  }
 0x163   :  { %725 = vmatprep.subr.bf16.mxu1 %v3204_v35 }
 0x164   :  { %489 = vmatpush1.bf16.msra.mxu0 %v3185_v26  ;;  %v3257_v26 = vld [vmem:[#allocation11 + $0x28] sm:$0xff]  }
 0x165   :  { %490 = vmatprep.subr.bf16.mxu0 %v3188_v28  ;;  %v3259_v28 = vld [vmem:[#allocation11 + $0x30] sm:$0xff]  }
 0x166   :  { %726 = vmatpush1.bf16.msra.mxu1 %v3208_v38 }
 0x167   :  { %727 = vmatprep.subr.bf16.mxu1 %v3210_v39 }
 0x168   :  { %491 = vmatpush1.bf16.msra.mxu0 %v3191_v29  ;;  %v3260_v29 = vld [vmem:[#allocation11 + $0x78] sm:$0xff]  }
 0x169   :  { %492 = vmatprep.subr.bf16.mxu0 %v3194_v32  ;;  %v3263_v32 = vld [vmem:[%s4564_s20 + $0x8] sm:$0xff]  }
 0x16a   :  { %728 = vmatpush1.bf16.msra.mxu1 %v3214_v41 }
 0x16b   :  { %729 = vmatprep.subr.bf16.mxu1 %v3216_v44 }
 0x16c   :  { %493 = vmatpush1.bf16.msra.mxu0 %v3197_v34  ;;  %v3807_v34 = vmov 1966171168  }
 0x16d   :  { %494 = vmatprep.subr.bf16.mxu0 %v3200_v36  ;;  %v754_v35 = vunpack.c.l.s4 %v3807_v34  ;;  %v756_v36 = vlaneseq }
 0x16e   :  { %730 = vmatpush1.bf16.msra.mxu1 %v3220_v48 }
 0x16f   :  { %731 = vmatprep.subr.bf16.mxu1 %v3222_v50  ;;  %v757_v38 = vshrl.u32 %v756_v36, 7 }
 0x170   :  { %495 = vmatpush1.bf16.msra.mxu0 %v3203_v37  ;;  %v755_v37 = vunpack.c.0.s8 %v754_v35 }
 0x171   :  { %496 = vmatprep.subr.bf16.mxu0 %v3206_v40  ;;  %v4264_v48 = vsub.s32 1, %v757_v38 }
 0x172   :  { %732 = vmatpush1.bf16.msra.mxu1 %v3226_v56  ;;  %v4259_v40 = vsub.s32 %v755_v37, %v757_v38 }
 0x173   :  { %733 = vmatprep.subr.bf16.mxu1 %v3228_v57 }
 0x174   :  { %497 = vmatpush1.bf16.msra.mxu0 %v3209_v42 }
 0x175   :  { %498 = vmatprep.subr.bf16.mxu0 %v3212_v43 }
 0x176   :  { %734 = vmatpush1.bf16.msra.mxu1 %v3232_v63 }
 0x177   :  { %735 = vmatprep.subr.bf16.mxu1 %v3234_v1 }
 0x178   :  { %499 = vmatpush1.bf16.msra.mxu0 %v3215_v47  ;;  %v4262_v47 = vsub.s32 0, %v757_v38 }
 0x179   :  { %500 = vmatprep.subr.bf16.mxu0 %v3218_v49  ;;  %v825_v49 = vld [vmem:[#allocation9] sm:$0x3] }
 0x17a   :  { %736 = vmatpush1.bf16.msra.mxu1 %v3238_v4  ;;  %v834_v62 = vrot.slane %v825_v49, %v4264_v48 }
 0x17b   :  { %737 = vmatprep.subr.bf16.mxu1 %v3240_v6 }
 0x17c   :  { %501 = vmatpush1.bf16.msra.mxu0 %v3221_v55  ;;  %v830_v55 = vrot.slane %v825_v49, %v4262_v47  ;;  %v3267_v49 = vld [vmem:[%s4564_s20 + $0x28] sm:$0xff]  }
 0x17d   :  { %502 = vmatprep.subr.bf16.mxu0 %v3224_v58 }
 0x17e   :  { %738 = vmatpush1.bf16.msra.mxu1 %v3242_v8 }
 0x17f   :  { %739 = vmatprep.subr.bf16.mxu1 %v3243_v10 }
 0x180   :  { %503 = vmatpush1.bf16.msra.mxu0 %v3227_v0 }
 0x181   :  { %504 = vmatprep.subr.bf16.mxu0 %v3230_v2 }
 0x182   :  { %740 = vmatpush1.bf16.msra.mxu1 %v3245_v12 }
 0x183   :  { %3046 = vmatprep.subr.bf16.mxu1 %v3262_v31 }
 0x184   :  { %505 = vmatpush1.bf16.msra.mxu0 %v3233_v5 }
 0x185   :  { %506 = vmatprep.subr.bf16.mxu0 %v3236_v7  ;;  %742 = vmatmul.mubr.bf16.vlgmr.msra.gmra.mrb[0].mxu1 %v4246_v17 }
 0x186   :  { %3047 = vmatpush3.bf16.msra.mxu1 %v3262_v31 }
 0x187   :  { %3048 = vmatprep.subr.bf16.mxu1 %v3263_v32 }
 0x188   :  { %507 = vmatpush1.bf16.msra.mxu0 %v3239_v9 }
 0x189   :  { %2950 = vmatprep.subr.bf16.mxu0 %v3246_v11 }
 0x18a   :  { %3049 = vmatpush3.bf16.msra.mxu1 %v3263_v32 }
 0x18b   :  { %509 = vmatmul.mubr.bf16.vlgmr.msra.gmra.mrb[0].mxu0 %v4243_v14  ;;  %3050 = vmatprep.subr.bf16.mxu1 %v3264_v33 }
 0x18c   :  { %2951 = vmatpush3.bf16.msra.mxu0 %v3247_v13 }
 0x18d   :  { %2952 = vmatprep.subr.bf16.mxu0 %v3248_v16 }
 0x18e   :  { %3051 = vmatpush3.bf16.msra.mxu1 %v3264_v33 }
 0x190   :  { %2953 = vmatpush3.bf16.msra.mxu0 %v3249_v18 }
 0x191   :  { %2954 = vmatprep.subr.bf16.mxu0 %v3250_v19 }
 0x194   :  { %2955 = vmatpush3.bf16.msra.mxu0 %v3251_v20 }
 0x195   :  { %2956 = vmatprep.subr.bf16.mxu0 %v3252_v21 }
 0x198   :  { %2957 = vmatpush3.bf16.msra.mxu0 %v3253_v22 }
 0x199   :  { %2958 = vmatprep.subr.bf16.mxu0 %v3254_v23 }
 0x19c   :  { %2959 = vmatpush3.bf16.msra.mxu0 %v3255_v24 }
 0x19d   :  { %2960 = vmatprep.subr.bf16.mxu0 %v3256_v25 }
 0x1a0   :  { %2961 = vmatpush3.bf16.msra.mxu0 %v3257_v26 }
 0x1a1   :  { %2962 = vmatprep.subr.bf16.mxu0 %v3258_v27 }
 0x1a4   :  { %2963 = vmatpush3.bf16.msra.mxu0 %v3259_v28 }
 0x1a5   :  { %2964 = vmatprep.subr.bf16.mxu0 %v3260_v29 }
 0x1a8   :  { %2965 = vmatpush3.bf16.msra.mxu0 %v3261_v30 }
 0x258   :  { %v743_v45 = vpop.f32.mrb[0].mxu1 }
 0x259   :  { %v745_v50 = vpop.f32.mrb[1].mxu1 }
 0x25a   :  { %v747_v51 = vpop.f32.mrb[2].mxu1 }
 0x25b   :  { %v748_v54 = vpop.f32.mrb[3].mxu1  ;;  %v3269_v51 = vld [vmem:[%s4564_s20 + $0x38] sm:$0xff]  }
 0x25e   :  { %v510_v39 = vpop.f32.mrb[0].mxu0 }
 0x25f   :  { %v512_v41 = vpop.f32.mrb[1].mxu0 }
 0x260   :  { %v752_v42 = vcombine.low %v510_v39, %v512_v41  ;;  %v514_v43 = vpop.f32.mrb[2].mxu0 }
 0x261   :  { %v515_v44 = vpop.f32.mrb[3].mxu0 }
 0x262   :  { %v759_v46 = vrot.slane %v752_v42, %v4259_v40 }
 0x264   :  { %v760_v52 = vcombine.high %v759_v46, %v759_v46  ;;  %v767_v53 = vrot.slane %v759_v46, %v4259_v40  ;;  %v3266_v46 = vld [vmem:[%s4564_s20 + $0x20] sm:$0xff]  }
 0x266   :  { %v774_v56 = vrot.slane %v760_v52, %v4259_v40  ;;  %v775_v57 = vcombine.high %v767_v53, %v767_v53  ;;  %v780_v58 = vrot.slane %v767_v53, %v4262_v47  ;;  %v784_v60 = vrot.slane %v767_v53, %v4264_v48  ;;  %v3270_v52 = vld [vmem:[%s4565_s24] sm:$0xff]   ;;  %v3271_v53 = vld [vmem:[%s4565_s24 + $0x8] sm:$0xff]  }
 0x267   :  { %3066 = vmatprep.subr.bf16.mxu0 %v3270_v52 }
 0x268   :  { %v776_v63 = vcombine.high %v774_v56, %v774_v56  ;;  %v788_v0 = vrot.slane %v774_v56, %v4262_v47  ;;  %v796_v1 = vrot.slane %v775_v57, %v4262_v47  ;;  %v817_v2 = vadd.f32 %v780_v58, %v743_v45 }
 0x269   :  { %v792_v3 = vrot.slane %v774_v56, %v4264_v48  ;;  %v800_v4 = vrot.slane %v775_v57, %v4264_v48  ;;  %v818_v5 = vadd.f32 %v784_v60, %v745_v50 }
 0x26a   :  { %v804_v6 = vrot.slane %v776_v63, %v4262_v47  ;;  %v819_v7 = vadd.f32 %v788_v0, %v743_v45  ;;  %v821_v8 = vadd.f32 %v796_v1, %v743_v45  ;;  %v837_v9 = vadd.f32 %v830_v55, %v817_v2 }
 0x26b   :  { %v808_v10 = vrot.slane %v776_v63, %v4264_v48  ;;  %v820_v11 = vadd.f32 %v792_v3, %v745_v50  ;;  %v822_v12 = vadd.f32 %v800_v4, %v745_v50  ;;  %v838_v13 = vadd.f32 %v834_v62, %v818_v5 }
 0x26c   :  { %v823_v15 = vadd.f32 %v804_v6, %v743_v45  ;;  %v839_v16 = vadd.f32 %v830_v55, %v819_v7  ;;  %v841_v18 = vadd.f32 %v830_v55, %v821_v8  ;;  %v853_v19 = vmul.f32 0.01, %v837_v9  ;;  %v3265_v45 = vld [vmem:[%s4564_s20 + $0x18] sm:$0xff]  }
 0x26d   :  { %v824_v20 = vadd.f32 %v808_v10, %v745_v50  ;;  %v840_v21 = vadd.f32 %v834_v62, %v820_v11  ;;  %v842_v22 = vadd.f32 %v834_v62, %v822_v12  ;;  %vm846_vm3 = vcmp.ge.f32.partialorder %v838_v13, 0.0  ;;  %3052 = vmatprep.subr.bf16.mxu1 %v3265_v45  ;;  %v3268_v50 = vld [vmem:[%s4564_s20 + $0x30] sm:$0xff]  }
 0x26e   :  { %v843_v23 = vadd.f32 %v830_v55, %v823_v15  ;;  %v855_v24 = vmul.f32 0.01, %v839_v16  ;;  %v854_v25 = vmul.f32 0.01, %v838_v13  ;;  %vm845_vm4 = vcmp.ge.f32.partialorder %v837_v9, 0.0  ;;  %3053 = vmatpush3.bf16.msra.mxu1 %v3265_v45 }
 0x26f   :  { %v844_v26 = vadd.f32 %v834_v62, %v824_v20  ;;  %vm848_vm5 = vcmp.ge.f32.partialorder %v840_v21, 0.0  ;;  %v856_v27 = vmul.f32 0.01, %v840_v21  ;;  %vm847_vm6 = vcmp.ge.f32.partialorder %v839_v16, 0.0  ;;  %3054 = vmatprep.subr.bf16.mxu1 %v3266_v46  ;;  %v2806_v55 = vld [vmem:[#allocation12] ss:$0 sm:$0xff] }
 0x270   :  { %v862_v28 = vsel %vm846_vm3, %v838_v13, %v854_v25  ;;  %v861_v29 = vsel %vm845_vm4, %v837_v9, %v853_v19  ;;  %v863_v30 = vsel %vm847_vm6, %v839_v16, %v855_v24  ;;  %vm850_vm7 = vcmp.ge.f32.partialorder %v842_v22, 0.0  ;;  %v2832_v45 = vld [vmem:[#allocation15] ss:$0 sm:$0xff] }
 0x271   :  { %v864_v31 = vsel %vm848_vm5, %v840_v21, %v856_v27  ;;  %v869_v32 = vpack.c.bf16 %v863_v30, %v861_v29  ;;  %vm852_vm8 = vcmp.ge.f32.partialorder %v844_v26, 0.0  ;;  %v858_v33 = vmul.f32 0.01, %v842_v22  ;;  %v3272_v21 = vld [vmem:[%s4565_s24 + $0x10] sm:$0xff]  }
 0x272   :  { %v870_v34 = vpack.c.bf16 %v864_v31, %v862_v28  ;;  %v860_v35 = vmul.f32 0.01, %v844_v26  ;;  %vm849_vm9 = vcmp.ge.f32.partialorder %v841_v18, 0.0  ;;  %vm851_vm10 = vcmp.ge.f32.partialorder %v843_v23, 0.0  ;;  %3055 = vmatpush3.bf16.msra.mxu1 %v3266_v46 }
 0x273   :  { %v857_v36 = vmul.f32 0.01, %v841_v18  ;;  %v859_v37 = vmul.f32 0.01, %v843_v23  ;;  %v866_v38 = vsel %vm850_vm7, %v842_v22, %v858_v33  ;;  %3056 = vmatprep.subr.bf16.mxu1 %v3267_v49  ;;  %v3273_v22 = vld [vmem:[%s4565_s24 + $0x18] sm:$0xff]   ;;  %vm1244_vm3 = vcmask 523264  }
 0x274   :  { %1040 = vmatprep.mubr.bf16.mxu0 %v870_v34  ;;  %v868_v39 = vsel %vm852_vm8, %v844_v26, %v860_v35  ;;  %vm1337_vm8 = vcmask 261120  }
 0x275   :  { %1041 = vmatmul.mubr.bf16.vlgmr.msra.gmra.mrb[4].mxu0 %v869_v32  ;;  %v872_v41 = vpack.c.bf16 %v868_v39, %v866_v38  ;;  %v865_v42 = vsel %vm849_vm9, %v841_v18, %v857_v36  ;;  %v867_v43 = vsel %vm851_vm10, %v843_v23, %v859_v37  ;;  %v2823_v23 = vld [vmem:[#allocation14] ss:$0 sm:$0xff]  ;;  %vm1393_vm9 = vcmask 48144  }
 0x276   :  { %v871_v44 = vpack.c.bf16 %v867_v43, %v865_v42  ;;  %3057 = vmatpush3.bf16.msra.mxu1 %v3267_v49  ;;  %3067 = vmatpush3.bf16.msra.mxu0 %v3270_v52  ;;  %v3274_v43 = vld [vmem:[%s4521_s11] sm:$0xff]   ;;  %vm1434_vm10 = vcmask 31744  }
 0x277   :  { %1048 = vmatprep.mubr.bf16.mxu0 %v872_v41  ;;  %3058 = vmatprep.subr.bf16.mxu1 %v3268_v50 }
 0x278   :  { %3068 = vmatprep.subr.bf16.mxu0 %v3271_v53 }
 0x27a   :  { %3059 = vmatpush3.bf16.msra.mxu1 %v3268_v50  ;;  %3069 = vmatpush3.bf16.msra.mxu0 %v3271_v53 }
 0x27b   :  { %3060 = vmatprep.subr.bf16.mxu1 %v3269_v51  ;;  %3070 = vmatprep.subr.bf16.mxu0 %v3272_v21 }
 0x27d   :  { %1049 = vmatmul.mubr.bf16.gmra.mrb[8].mxu0 %v871_v44  ;;  %v3275_v44 = vld [vmem:[%s4521_s11 + $0x8] sm:$0xff]   ;;  %s3808_s11 = smov 126  }
 0x27e   :  { %3061 = vmatpush3.bf16.msra.mxu1 %v3269_v51  ;;  %3071 = vmatpush3.bf16.msra.mxu0 %v3272_v21 }
 0x27f   :  { %3072 = vmatprep.subr.bf16.mxu0 %v3273_v22  ;;  %3078 = vmatprep.subr.bf16.mxu1 %v3274_v43 }
 0x282   :  { %3073 = vmatpush3.bf16.msra.mxu0 %v3273_v22 }
 0x348   :  { %v2966_v54 = vpop.f32.mrb[4].mxu0 }
 0x349   :  { %v2967_v56 = vpop.f32.mrb[5].mxu0 }
 0x34a   :  { %v2968_v57 = vadd.f32 %v2967_v56, %v2966_v54  ;;  %v2969_v58 = vpop.f32.mrb[6].mxu0 }
 0x34b   :  { %v2970_v60 = vpop.f32.mrb[7].mxu0 }
 0x34c   :  { %v1043_v62 = vadd.f32 %v2968_v57, %v2806_v55  ;;  %v2971_v63 = vadd.f32 %v2970_v60, %v2969_v58 }
 0x34e   :  { %v1061_v0 = vmul.f32 0.01, %v1043_v62  ;;  %v1046_v1 = vadd.f32 %v2971_v63, %v2806_v55  ;;  %vm1057_vm11 = vcmp.ge.f32.partialorder %v1043_v62, 0.0 }
 0x350   :  { %vm1058_vm12 = vcmp.ge.f32.partialorder %v1046_v1, 0.0  ;;  %v1062_v2 = vmul.f32 0.01, %v1046_v1  ;;  %v2972_v3 = vpop.f32.mrb[8].mxu0  ;;  %v1065_v7 = vsel %vm1057_vm11, %v1043_v62, %v1061_v0  ;;  %vm1957_vm11 = vcmask 1041408  }
 0x351   :  { %v2973_v4 = vpop.f32.mrb[9].mxu0 }
 0x352   :  { %v2974_v5 = vadd.f32 %v2973_v4, %v2972_v3  ;;  %v2975_v6 = vpop.f32.mrb[10].mxu0  ;;  %v1066_v8 = vsel %vm1058_vm12, %v1046_v1, %v1062_v2  ;;  %v2839_v3 = vld [vmem:[#allocation17] ss:$0 sm:$0xff] }
 0x353   :  { %v2976_v9 = vpop.f32.mrb[11].mxu0  ;;  %v1069_v10 = vpack.c.bf16 %v1066_v8, %v1065_v7 }
 0x354   :  { %v1051_v11 = vadd.f32 %v2974_v5, %v2806_v55  ;;  %v2977_v12 = vadd.f32 %v2976_v9, %v2975_v6 }
 0x355   :  { %3062 = vmatprep.mubr.bf16.mxu1 %v1069_v10 }
 0x356   :  { %v1063_v13 = vmul.f32 0.01, %v1051_v11  ;;  %v1054_v15 = vadd.f32 %v2977_v12, %v2806_v55  ;;  %vm1059_vm13 = vcmp.ge.f32.partialorder %v1051_v11, 0.0 }
 0x358   :  { %vm1060_vm14 = vcmp.ge.f32.partialorder %v1054_v15, 0.0  ;;  %v1064_v16 = vmul.f32 0.01, %v1054_v15  ;;  %v1067_v18 = vsel %vm1059_vm13, %v1051_v11, %v1063_v13 }
 0x35a   :  { %v1068_v19 = vsel %vm1060_vm14, %v1054_v15, %v1064_v16 }
 0x35b   :  { %v1070_v20 = vpack.c.bf16 %v1068_v19, %v1067_v18 }
 0x35d   :  { %3063 = vmatmul.mubr.bf16.vlgmr.msra.gmra.mrb[4].mxu1 %v1070_v20 }
 0x35e   :  { %3079 = vmatpush3.bf16.msra.mxu1 %v3274_v43  ;;  %v3278_v43 = vld [vmem:[#allocation18 + $0x4] ss:$8 sps:$4 sm:$0xff]  }
 0x35f   :  { %3080 = vmatprep.subr.bf16.mxu1 %v3275_v44 }
 0x362   :  { %3081 = vmatpush3.bf16.msra.mxu1 %v3275_v44  ;;  %v3281_v44 = vld [vmem:[#allocation18 + $0x14] ss:$8 sps:$4 sm:$0xff]  }
 0x363   :  { %1647 = vmatprep.subr.bf16.mxu1 %v3278_v43  ;;  %v3357_v43 = vld [vmem:[#allocation20 + $0xc0] ss:$8 sps:$4 sm:$0xff]  }
 0x430   :  { %v3064_v24 = vpop.f32.mrb[4].mxu1 }
 0x431   :  { %v1185_v25 = vadd.f32 %v3064_v24, %v2823_v23  ;;  %v1176_v26 = vpop.f32.mrb[5].mxu1 }
 0x432   :  { %v1177_v27 = vadd.f32 %v2823_v23, %v1176_v26  ;;  %v3065_v28 = vpop.f32.mrb[6].mxu1 }
 0x433   :  { %v1197_v29 = vmul.f32 0.01, %v1185_v25  ;;  %v1188_v30 = vadd.f32 %v3065_v28, %v2823_v23  ;;  %v1179_v31 = vpop.f32.mrb[7].mxu1  ;;  %vm1193_vm15 = vcmp.ge.f32.partialorder %v1185_v25, 0.0 }
 0x434   :  { %v1195_v32 = vmul.f32 0.01, %v1177_v27  ;;  %v1180_v33 = vadd.f32 %v2823_v23, %v1179_v31  ;;  %vm1191_vm0 = vcmp.ge.f32.partialorder %v1177_v27, 0.0 }
 0x435   :  { %vm1194_vm1 = vcmp.ge.f32.partialorder %v1188_v30, 0.0  ;;  %v1198_v34 = vmul.f32 0.01, %v1188_v30  ;;  %v1201_v36 = vsel %vm1193_vm15, %v1185_v25, %v1197_v29 }
 0x436   :  { %vm1192_vm2 = vcmp.ge.f32.partialorder %v1180_v33, 0.0  ;;  %v1196_v35 = vmul.f32 0.01, %v1180_v33  ;;  %v1199_v38 = vsel %vm1191_vm0, %v1177_v27, %v1195_v32 }
 0x437   :  { %v1202_v37 = vsel %vm1194_vm1, %v1188_v30, %v1198_v34 }
 0x438   :  { %v1204_v39 = vpack.c.bf16 %v1202_v37, %v1201_v36  ;;  %v1200_v41 = vsel %vm1192_vm2, %v1180_v33, %v1196_v35 }
 0x439   :  { %v1203_v42 = vpack.c.bf16 %v1200_v41, %v1199_v38 }
 0x43b   :  { %3074 = vmatprep.mubr.msk.bf16.mxu0 %vm1244_vm3, %v1203_v42  ;;  %v3276_v42 = vld [vmem:[#allocation18] ss:$8 sps:$4 sm:$0xff]  }
 0x43c   :  { %3075 = vmatmul.mubr.msk.bf16.vlgmr.msra.gmra.mrb[12].mxu0 %vm1244_vm3, %v1204_v39 }
 0x43d   :  { %1912 = vmatprep.mubr.bf16.mxu0 %v4224_v61 }
 0x50f   :  { %v3076_v46 = vpop.f32.mrb[12].mxu0 }
 0x510   :  { %v1294_v49 = vadd.f32 %v3076_v46, %v2832_v45  ;;  %v1285_v50 = vpop.f32.mrb[13].mxu0  ;;  %v3287_v46 = vld [vmem:[#allocation20 + $0x4] ss:$8 sps:$4 sm:$0xff]  }
 0x511   :  { %v1286_v51 = vadd.f32 %v2832_v45, %v1285_v50  ;;  %v3077_v52 = vpop.f32.mrb[14].mxu0  ;;  %v3293_v50 = vld [vmem:[#allocation20 + $0x14] ss:$8 sps:$4 sm:$0xff]   ;;  %1880 = vmatprep.subr.bf16.mxu0 %v3287_v46  ;;  %v3356_v46 = vld [vmem:[#allocation18 + $0xe4] ss:$8 sps:$4 sm:$0xff]  }
 0x512   :  { %v1306_v53 = vmul.f32 0.01, %v1294_v49  ;;  %v1297_v61 = vadd.f32 %v3077_v52, %v2832_v45  ;;  %v1288_v54 = vpop.f32.mrb[15].mxu0  ;;  %vm1302_vm4 = vcmp.ge.f32.partialorder %v1294_v49, 0.0  ;;  %v3291_v52 = vld [vmem:[#allocation20 + $0x10] ss:$8 sps:$4 sm:$0xff]  }
 0x513   :  { %v1304_v55 = vmul.f32 0.01, %v1286_v51  ;;  %v1289_v56 = vadd.f32 %v2832_v45, %v1288_v54  ;;  %vm1300_vm5 = vcmp.ge.f32.partialorder %v1286_v51, 0.0  ;;  %v3285_v45 = vld [vmem:[#allocation20] ss:$8 sps:$4 sm:$0xff]  }
 0x514   :  { %vm1303_vm6 = vcmp.ge.f32.partialorder %v1297_v61, 0.0  ;;  %v1307_v57 = vmul.f32 0.01, %v1297_v61  ;;  %v1310_v60 = vsel %vm1302_vm4, %v1294_v49, %v1306_v53  ;;  %v3279_v49 = vld [vmem:[#allocation18 + $0x10] ss:$8 sps:$4 sm:$0xff]   ;;  %1881 = vmatpush1.bf16.msra.mxu0 %v3285_v45 }
 0x515   :  { %vm1301_vm7 = vcmp.ge.f32.partialorder %v1289_v56, 0.0  ;;  %v1305_v58 = vmul.f32 0.01, %v1289_v56  ;;  %v1308_v63 = vsel %vm1300_vm5, %v1286_v51, %v1304_v55  ;;  %v3284_v51 = vld [vmem:[#allocation18 + $0x24] ss:$8 sps:$4 sm:$0xff]   ;;  %1882 = vmatprep.subr.bf16.mxu0 %v3293_v50 }
 0x516   :  { %v1311_v62 = vsel %vm1303_vm6, %v1297_v61, %v1307_v57  ;;  %v3299_v53 = vld [vmem:[#allocation20 + $0x24] ss:$8 sps:$4 sm:$0xff]   ;;  %v3282_v61 = vld [vmem:[#allocation18 + $0x20] ss:$8 sps:$4 sm:$0xff]   ;;  %v3290_v54 = vld [vmem:[#allocation18 + $0x34] ss:$8 sps:$4 sm:$0xff]  }
 0x517   :  { %v1313_v0 = vpack.c.bf16 %v1311_v62, %v1310_v60  ;;  %v1309_v1 = vsel %vm1301_vm7, %v1289_v56, %v1305_v58  ;;  %v3297_v55 = vld [vmem:[#allocation20 + $0x20] ss:$8 sps:$4 sm:$0xff]   ;;  %v3305_v56 = vld [vmem:[#allocation20 + $0x34] ss:$8 sps:$4 sm:$0xff]   ;;  %v3288_v57 = vld [vmem:[#allocation18 + $0x30] ss:$8 sps:$4 sm:$0xff]  }
 0x518   :  { %v1312_v2 = vpack.c.bf16 %v1309_v1, %v1308_v63  ;;  %1883 = vmatpush1.bf16.msra.mxu0 %v3291_v52  ;;  %v3296_v58 = vld [vmem:[#allocation18 + $0x44] ss:$8 sps:$4 sm:$0xff]   ;;  %v3303_v60 = vld [vmem:[#allocation20 + $0x30] ss:$8 sps:$4 sm:$0xff]   ;;  %v3294_v63 = vld [vmem:[#allocation18 + $0x40] ss:$8 sps:$4 sm:$0xff]  }
 0x519   :  { %1884 = vmatprep.subr.bf16.mxu0 %v3299_v53  ;;  %v3311_v62 = vld [vmem:[#allocation20 + $0x44] ss:$8 sps:$4 sm:$0xff]   ;;  %v3309_v1 = vld [vmem:[#allocation20 + $0x40] ss:$8 sps:$4 sm:$0xff]   ;;  %v3348_v45 = vld [vmem:[#allocation18 + $0xd0] ss:$8 sps:$4 sm:$0xff]  }
 0x51a   :  { %3082 = vmatprep.mubr.msk.bf16.mxu1 %vm1337_vm8, %v1312_v2  ;;  %v3317_v2 = vld [vmem:[#allocation20 + $0x54] ss:$8 sps:$4 sm:$0xff]   ;;  %v3368_v50 = vld [vmem:[#allocation20 + $0xe4] ss:$8 sps:$4 sm:$0xff]   ;;  %v3366_v53 = vld [vmem:[#allocation20 + $0xe0] ss:$8 sps:$4 sm:$0xff]  }
 0x51b   :  { %3083 = vmatmul.mubr.msk.bf16.vlgmr.msra.gmra.mrb[8].mxu1 %vm1337_vm8, %v1313_v0  ;;  %v3302_v0 = vld [vmem:[#allocation18 + $0x54] ss:$8 sps:$4 sm:$0xff]  }
 0x51c   :  { %1679 = vmatprep.mubr.bf16.mxu1 %v4222_v59  ;;  %1648 = vmatpush1.bf16.msra.mxu1 %v3276_v42  ;;  %v3350_v42 = vld [vmem:[#allocation18 + $0xd4] ss:$8 sps:$4 sm:$0xff]  }
 0x51d   :  { %1649 = vmatprep.subr.bf16.mxu1 %v3281_v44  ;;  %1885 = vmatpush1.bf16.msra.mxu0 %v3297_v55  ;;  %v3365_v44 = vld [vmem:[#allocation20 + $0xd4] ss:$8 sps:$4 sm:$0xff]   ;;  %v3360_v55 = vld [vmem:[#allocation18 + $0xf0] ss:$8 sps:$4 sm:$0xff]  }
 0x51e   :  { %1886 = vmatprep.subr.bf16.mxu0 %v3305_v56  ;;  %v3362_v52 = vld [vmem:[#allocation18 + $0xf4] ss:$8 sps:$4 sm:$0xff]  }
 0x520   :  { %1650 = vmatpush1.bf16.msra.mxu1 %v3279_v49  ;;  %v3363_v49 = vld [vmem:[#allocation20 + $0xd0] ss:$8 sps:$4 sm:$0xff]  }
 0x521   :  { %1651 = vmatprep.subr.bf16.mxu1 %v3284_v51  ;;  %1887 = vmatpush1.bf16.msra.mxu0 %v3303_v60  ;;  %v3354_v51 = vld [vmem:[#allocation18 + $0xe0] ss:$8 sps:$4 sm:$0xff]   ;;  %v3809_v60 = vmov 0  }
 0x522   :  { %1888 = vmatprep.subr.bf16.mxu0 %v3311_v62 }
 0x524   :  { %1652 = vmatpush1.bf16.msra.mxu1 %v3282_v61  ;;  %v2908_v61 = vld.sshfl [vmem:[#allocation21] sm:$0x33 pattern:$0x76325410] }
 0x525   :  { %1653 = vmatprep.subr.bf16.mxu1 %v3290_v54  ;;  %1889 = vmatpush1.bf16.msra.mxu0 %v3309_v1  ;;  %v3371_v54 = vld [vmem:[#allocation20 + $0xf4] ss:$8 sps:$4 sm:$0xff]   ;;  %v1950_v56 = vcombine.high %v2908_v61, %v2908_v61 }
 0x526   :  { %1890 = vmatprep.subr.bf16.mxu0 %v3317_v2 }
 0x528   :  { %1654 = vmatpush1.bf16.msra.mxu1 %v3288_v57  ;;  %v3369_v57 = vld [vmem:[#allocation20 + $0xf0] ss:$8 sps:$4 sm:$0xff]  }
 0x529   :  { %1655 = vmatprep.subr.bf16.mxu1 %v3296_v58  ;;  %v1959_v58 = vsel %vm1957_vm11, %v2908_v61, 0 }
 0x52c   :  { %1656 = vmatpush1.bf16.msra.mxu1 %v3294_v63 }
 0x52d   :  { %1657 = vmatprep.subr.bf16.mxu1 %v3302_v0 }
 0x5ee   :  { %v3084_v4 = vpop.f32.mrb[8].mxu1 }
 0x5ef   :  { %v4317_v5 = vadd.f32 %v3084_v4, %v2839_v3  ;;  %v1378_v6 = vpop.f32.mrb[9].mxu1  ;;  %v3308_v4 = vld [vmem:[#allocation18 + $0x64] ss:$8 sps:$4 sm:$0xff]  }
 0x5f0   :  { %v4319_v7 = vadd.f32 %v2839_v3, %v1378_v6  ;;  %v3085_v8 = vpop.f32.mrb[10].mxu1  ;;  %v3315_v6 = vld [vmem:[#allocation20 + $0x50] ss:$8 sps:$4 sm:$0xff]  }
 0x5f1   :  { %v4321_v9 = vadd.f32 %v3085_v8, %v2839_v3  ;;  %v1381_v10 = vpop.f32.mrb[11].mxu1  ;;  %v1400_v11 = vsel %vm1393_vm9, %v4317_v5, -inf  ;;  %v3323_v8 = vld [vmem:[#allocation20 + $0x64] ss:$8 sps:$4 sm:$0xff]   ;;  %1891 = vmatpush1.bf16.msra.mxu0 %v3315_v6 }
 0x5f2   :  { %v4324_v12 = vadd.f32 %v2839_v3, %v1381_v10  ;;  %1401 = vmax.xlane.f32.xlu1 %v1400_v11  ;;  %v1394_v13 = vsel %vm1393_vm9, %v4319_v7, -inf  ;;  %v3300_v3 = vld [vmem:[#allocation18 + $0x50] ss:$8 sps:$4 sm:$0xff]   ;;  %v3306_v10 = vld [vmem:[#allocation18 + $0x60] ss:$8 sps:$4 sm:$0xff]   ;;  %1892 = vmatprep.subr.bf16.mxu0 %v3323_v8 }
 0x5f3   :  { %1395 = vmax.xlane.f32.xlu0 %v1394_v13  ;;  %v1403_v59 = vsel %vm1393_vm9, %v4321_v9, -inf  ;;  %1658 = vmatpush1.bf16.msra.mxu1 %v3300_v3  ;;  %v3314_v11 = vld [vmem:[#allocation18 + $0x74] ss:$8 sps:$4 sm:$0xff]   ;;  %v3321_v13 = vld [vmem:[#allocation20 + $0x60] ss:$8 sps:$4 sm:$0xff]  }
 0x5f4   :  { %v1397_v15 = vsel %vm1393_vm9, %v4324_v12, -inf  ;;  %1659 = vmatprep.subr.bf16.mxu1 %v3308_v4 }
 0x5f5   :  { %1893 = vmatpush1.bf16.msra.mxu0 %v3321_v13 }
 0x5f6   :  { %1404 = vmax.xlane.f32.xlu1 %v1403_v59  ;;  %v3329_v59 = vld [vmem:[#allocation20 + $0x74] ss:$8 sps:$4 sm:$0xff]  }
 0x5f7   :  { %1398 = vmax.xlane.f32.xlu0 %v1397_v15  ;;  %1660 = vmatpush1.bf16.msra.mxu1 %v3306_v10  ;;  %v3312_v15 = vld [vmem:[#allocation18 + $0x70] ss:$8 sps:$4 sm:$0xff]  }
 0x5f8   :  { %1661 = vmatprep.subr.bf16.mxu1 %v3314_v11  ;;  %1894 = vmatprep.subr.bf16.mxu0 %v3329_v59 }
 0x5fb   :  { %1662 = vmatpush1.bf16.msra.mxu1 %v3312_v15 }
 0x67f   :  { %v1402_v16 = vpop.xlane.xlu1 %1401 }
 0x680   :  { %v1396_v18 = vpop.xlane.xlu0 %1395  ;;  %v1408_v22 = vsub.f32 %v4317_v5, %v1402_v16  ;;  %v3320_v16 = vld [vmem:[#allocation18 + $0x84] ss:$8 sps:$4 sm:$0xff]  }
 0x681   :  { %v1406_v19 = vsub.f32 %v4319_v7, %v1396_v18  ;;  %v3327_v18 = vld [vmem:[#allocation20 + $0x70] ss:$8 sps:$4 sm:$0xff]   ;;  %1663 = vmatprep.subr.bf16.mxu1 %v3320_v16 }
 0x682   :  { %v1414_v26 = vmul.f32 1.442695, %v1408_v22  ;;  %1895 = vmatpush1.bf16.msra.mxu0 %v3327_v18  ;;  %v3333_v22 = vld [vmem:[#allocation20 + $0x80] ss:$8 sps:$4 sm:$0xff]  }
 0x683   :  { %v1410_v20 = vmul.f32 1.442695, %v1406_v19  ;;  %v1405_v24 = vpop.xlane.xlu1 %1404  ;;  %v3335_v19 = vld [vmem:[#allocation20 + $0x84] ss:$8 sps:$4 sm:$0xff]  }
 0x684   :  { %v1399_v21 = vpop.xlane.xlu0 %1398  ;;  %v1409_v27 = vsub.f32 %v4321_v9, %v1405_v24  ;;  %1896 = vmatprep.subr.bf16.mxu0 %v3335_v19  ;;  %v3324_v24 = vld [vmem:[#allocation18 + $0x90] ss:$8 sps:$4 sm:$0xff]  }
 0x685   :  { %3402 = vpow2.f32 %v1410_v20  ;;  %v1407_v23 = vsub.f32 %v4324_v12, %v1399_v21  ;;  %v3318_v20 = vld [vmem:[#allocation18 + $0x80] ss:$8 sps:$4 sm:$0xff]   ;;  %v3326_v21 = vld [vmem:[#allocation18 + $0x94] ss:$8 sps:$4 sm:$0xff]  }
 0x686   :  { %v1416_v28 = vmul.f32 1.442695, %v1409_v27  ;;  %1664 = vmatpush1.bf16.msra.mxu1 %v3318_v20  ;;  %1897 = vmatpush1.bf16.msra.mxu0 %v3333_v22  ;;  %v3347_v27 = vld [vmem:[#allocation20 + $0xa4] ss:$8 sps:$4 sm:$0xff]   ;;  %v3378_v22 = vld [vmem:[%s4527_s17 + $0x58] sm:$0xff]  }
 0x687   :  { %v1412_v25 = vmul.f32 1.442695, %v1407_v23  ;;  %v3341_v23 = vld [vmem:[#allocation20 + $0x94] ss:$8 sps:$4 sm:$0xff]   ;;  %1665 = vmatprep.subr.bf16.mxu1 %v3326_v21 }
 0x688   :  { %1898 = vmatprep.subr.bf16.mxu0 %v3341_v23  ;;  %v3376_v21 = vld [vmem:[%s4527_s17 + $0x50] sm:$0xff]   ;;  %v3380_v23 = vld [vmem:[%s4527_s17 + $0x60] sm:$0xff]  }
 0x689   :  { %3404 = vpow2.f32 %v1412_v25  ;;  %v3332_v25 = vld [vmem:[#allocation18 + $0xa4] ss:$8 sps:$4 sm:$0xff]  }
 0x68a   :  { %3406 = vpow2.f32 %v1414_v26  ;;  %v3339_v26 = vld [vmem:[#allocation20 + $0x90] ss:$8 sps:$4 sm:$0xff]   ;;  %1666 = vmatpush1.bf16.msra.mxu1 %v3324_v24  ;;  %v3381_v24 = vld [vmem:[%s4527_s17 + $0x20] sm:$0xff]  }
 0x68b   :  { %3408 = vpow2.f32 %v1416_v28  ;;  %v3330_v28 = vld [vmem:[#allocation18 + $0xa0] ss:$8 sps:$4 sm:$0xff]   ;;  %1667 = vmatprep.subr.bf16.mxu1 %v3332_v25  ;;  %1899 = vmatpush1.bf16.msra.mxu0 %v3339_v26 }
 0x68c   :  { %1900 = vmatprep.subr.bf16.mxu0 %v3347_v27 }
 0x68e   :  { %1668 = vmatpush1.bf16.msra.mxu1 %v3330_v28 }
 0x68f   :  { %v4333_v29 = vpop.eup %3402 }
 0x690   :  { %1422 = vrot.lane.b32.xlu0 %v4333_v29, %s3808_s11 }
 0x693   :  { %v4337_v30 = vpop.eup %3404 }
 0x694   :  { %1424 = vrot.lane.b32.xlu1 %v4337_v30, %s3808_s11  ;;  %v4341_v31 = vpop.eup %3406 }
 0x695   :  { %v4345_v32 = vpop.eup %3408 }
 0x698   :  { %1426 = vrot.lane.b32.xlu1 %v4341_v31, %s3808_s11 }
 0x69c   :  { %1428 = vrot.lane.b32.xlu1 %v4345_v32, %s3808_s11 }
 0x702   :  { %v1423_v33 = vpop.permute.xlu0 %1422 }
 0x703   :  { %v1435_v34 = vsel %vm1434_vm10, %v1423_v33, 0.0  ;;  %v3338_v33 = vld [vmem:[#allocation18 + $0xb4] ss:$8 sps:$4 sm:$0xff]  }
 0x704   :  { %1436 = vadd.xlane.f32.xlu0 %v1435_v34  ;;  %v3345_v34 = vld [vmem:[#allocation20 + $0xa0] ss:$8 sps:$4 sm:$0xff]   ;;  %1669 = vmatprep.subr.bf16.mxu1 %v3338_v33 }
 0x705   :  { %1901 = vmatpush1.bf16.msra.mxu0 %v3345_v34 }
 0x706   :  { %v1425_v35 = vpop.permute.xlu1 %1424 }
 0x707   :  { %v1438_v36 = vsel %vm1434_vm10, %v1425_v35, 0.0  ;;  %v3353_v35 = vld [vmem:[#allocation20 + $0xb4] ss:$8 sps:$4 sm:$0xff]  }
 0x708   :  { %1439 = vadd.xlane.f32.xlu1 %v1438_v36  ;;  %v3336_v36 = vld [vmem:[#allocation18 + $0xb0] ss:$8 sps:$4 sm:$0xff]   ;;  %1902 = vmatprep.subr.bf16.mxu0 %v3353_v35 }
 0x709   :  { %1670 = vmatpush1.bf16.msra.mxu1 %v3336_v36 }
 0x70a   :  { %v1427_v37 = vpop.permute.xlu1 %1426 }
 0x70b   :  { %v1441_v38 = vsel %vm1434_vm10, %v1427_v37, 0.0  ;;  %v3344_v37 = vld [vmem:[#allocation18 + $0xc4] ss:$8 sps:$4 sm:$0xff]  }
 0x70c   :  { %1442 = vadd.xlane.f32.xlu0 %v1441_v38  ;;  %v3351_v38 = vld [vmem:[#allocation20 + $0xb0] ss:$8 sps:$4 sm:$0xff]   ;;  %1671 = vmatprep.subr.bf16.mxu1 %v3344_v37 }
 0x70d   :  { %1903 = vmatpush1.bf16.msra.mxu0 %v3351_v38 }
 0x70e   :  { %v1429_v39 = vpop.permute.xlu1 %1428 }
 0x70f   :  { %v1444_v41 = vsel %vm1434_vm10, %v1429_v39, 0.0  ;;  %v3359_v39 = vld [vmem:[#allocation20 + $0xc4] ss:$8 sps:$4 sm:$0xff]  }
 0x710   :  { %1445 = vadd.xlane.f32.xlu0 %v1444_v41  ;;  %v3342_v41 = vld [vmem:[#allocation18 + $0xc0] ss:$8 sps:$4 sm:$0xff]   ;;  %1904 = vmatprep.subr.bf16.mxu0 %v3359_v39 }
 0x711   :  { %1672 = vmatpush1.bf16.msra.mxu1 %v3342_v41  ;;  %1905 = vmatpush1.bf16.msra.mxu0 %v3357_v43 }
 0x712   :  { %1673 = vmatprep.subr.bf16.mxu1 %v3350_v42  ;;  %1906 = vmatprep.subr.bf16.mxu0 %v3365_v44 }
 0x715   :  { %1674 = vmatpush1.bf16.msra.mxu1 %v3348_v45  ;;  %1907 = vmatpush1.bf16.msra.mxu0 %v3363_v49 }
 0x716   :  { %1675 = vmatprep.subr.bf16.mxu1 %v3356_v46  ;;  %1908 = vmatprep.subr.bf16.mxu0 %v3368_v50 }
 0x719   :  { %1676 = vmatpush1.bf16.msra.mxu1 %v3354_v51  ;;  %1909 = vmatpush1.bf16.msra.mxu0 %v3366_v53 }
 0x71a   :  { %1677 = vmatprep.subr.bf16.mxu1 %v3362_v52  ;;  %1910 = vmatprep.subr.bf16.mxu0 %v3371_v54 }
 0x71d   :  { %1678 = vmatpush1.bf16.msra.mxu1 %v3360_v55  ;;  %1911 = vmatpush1.bf16.msra.mxu0 %v3369_v57  ;;  %v3382_v55 = vld [vmem:[%s4527_s17 + $0x68] sm:$0xff]  }
 0x71e   :  { %2909 = vmatprep.subr.msk.bf16.mxu1 %vm1957_vm11, %v1950_v56 }
 0x720   :  { %1680 = vmatmul.mubr.bf16.vlgmr.msra.gmra.mrb[12].mxu1 %v4243_v14  ;;  %1913 = vmatmul.mubr.bf16.vlgmr.msra.gmra.mrb[16].mxu0 %v4246_v17 }
 0x721   :  { %1965 = vmatpush1.bf16.msra.mxu1 %v1959_v58  ;;  %1996 = vmatprep.mubr.bf16.mxu1 %v3809_v60 }
 0x791   :  { %v1437_v62 = vpop.xlane.xlu0 %1436 }
 0x792   :  { %3410 = vrcp.f32 %v1437_v62  ;;  %v3383_v62 = vld [vmem:[%s4527_s17 + $0x28] sm:$0xff]  }
 0x795   :  { %v1440_v63 = vpop.xlane.xlu1 %1439 }
 0x796   :  { %3412 = vrcp.f32 %v1440_v63 }
 0x799   :  { %v1443_v0 = vpop.xlane.xlu0 %1442 }
 0x79a   :  { %3414 = vrcp.f32 %v1443_v0 }
 0x79c   :  { %v3411_v1 = vpop.eup %3410 }
 0x79d   :  { %v1451_v2 = vmul.f32 %v3411_v1, %v4333_v29  ;;  %v1446_v3 = vpop.xlane.xlu0 %1445 }
 0x79e   :  { %3416 = vrcp.f32 %v1446_v3  ;;  %v3384_v3 = vld [vmem:[%s4527_s17 + $0x70] sm:$0xff]  }
 0x79f   :  { %v1925_v6 = vmul.f32 0.01, %v1451_v2  ;;  %vm1921_vm12 = vcmp.ge.f32.partialorder %v1451_v2, 0.0 }
 0x7a0   :  { %v3413_v4 = vpop.eup %3412 }
 0x7a1   :  { %v1452_v14 = vmul.f32 %v3413_v4, %v4337_v30  ;;  %v1929_v11 = vsel %vm1921_vm12, %v1451_v2, %v1925_v6  ;;  %v3385_v4 = vld [vmem:[%s4527_s17 + $0x30] sm:$0xff]   ;;  %v3387_v6 = vld [vmem:[%s4527_s17 + $0x38] sm:$0xff]  }
 0x7a3   :  { %vm1922_vm13 = vcmp.ge.f32.partialorder %v1452_v14, 0.0  ;;  %v1926_v8 = vmul.f32 0.01, %v1452_v14 }
 0x7a4   :  { %v3415_v10 = vpop.eup %3414 }
 0x7a5   :  { %v1453_v17 = vmul.f32 %v3415_v10, %v4341_v31  ;;  %v1930_v13 = vsel %vm1922_vm13, %v1452_v14, %v1926_v8  ;;  %v3372_v31 = vld [vmem:[%s4527_s17 + $0x40] sm:$0xff]   ;;  %v3389_v10 = vld [vmem:[%s4529_s19 + $0x8] sm:$0xff]  }
 0x7a6   :  { %v1933_v59 = vpack.c.bf16 %v1930_v13, %v1929_v11  ;;  %2998 = vmatprep.subr.bf16.mxu0 %v3372_v31  ;;  %v3388_v8 = vld [vmem:[%s4529_s19] sm:$0xff]  }
 0x7a7   :  { %v1927_v16 = vmul.f32 0.01, %v1453_v17  ;;  %vm1923_vm14 = vcmp.ge.f32.partialorder %v1453_v17, 0.0  ;;  %3086 = vmatprep.subr.bf16.mxu1 %v3388_v8  ;;  %v2100_v11 = vld [vmem:[#allocation23] sm:$0x3] }
 0x7a8   :  { %v3417_v15 = vpop.eup %3416  ;;  %1938 = vrot.lane.b32.xlu0 %v1933_v59, %s3808_s11  ;;  %v2105_v13 = vrot.slane %v2100_v11, %v4262_v47 }
 0x7a9   :  { %v1454_v29 = vmul.f32 %v3417_v15, %v4345_v32  ;;  %v1931_v30 = vsel %vm1923_vm14, %v1453_v17, %v1927_v16  ;;  %v3373_v32 = vld [vmem:[%s4527_s17] sm:$0xff]   ;;  %v2109_v15 = vrot.slane %v2100_v11, %v4264_v48 }
 0x7aa   :  { %2999 = vmatpush3.bf16.msra.mxu0 %v3373_v32 }
 0x7ab   :  { %vm1924_vm15 = vcmp.ge.f32.partialorder %v1454_v29, 0.0  ;;  %v1928_v18 = vmul.f32 0.01, %v1454_v29 }
 0x7ac   :  { %2674 = vrot.lane.b32.xlu0 %v4317_v5, %s3810_s13  ;;  %v3374_v5 = vld [vmem:[%s4527_s17 + $0x48] sm:$0xff]  }
 0x7ad   :  { %v1932_v19 = vsel %vm1924_vm15, %v1454_v29, %v1928_v18  ;;  %3000 = vmatprep.subr.bf16.mxu0 %v3374_v5 }
 0x7ae   :  { %v1934_v20 = vpack.c.bf16 %v1932_v19, %v1931_v30 }
 0x7b0   :  { %2686 = vrot.lane.b32.xlu0 %v1451_v2, %s3810_s13  ;;  %1940 = vrot.lane.b32.xlu1 %v1934_v20, %s3808_s11 }
 0x7b4   :  { %2690 = vrot.lane.b32.xlu0 %v1453_v17, %s3810_s13  ;;  %2670 = vrot.lane.b32.xlu1 %v4319_v7, %s3810_s13  ;;  %v3375_v7 = vld [vmem:[%s4527_s17 + $0x8] sm:$0xff]   ;;  %v3390_v17 = vld [vmem:[%s4529_s19 + $0x10] sm:$0xff]  }
 0x7b5   :  { %3001 = vmatpush3.bf16.msra.mxu0 %v3375_v7 }
 0x7b6   :  { %3002 = vmatprep.subr.bf16.mxu0 %v3376_v21 }
 0x7b8   :  { %2672 = vrot.lane.b32.xlu1 %v4324_v12, %s3810_s13  ;;  %v3377_v12 = vld [vmem:[%s4527_s17 + $0x10] sm:$0xff]  }
 0x7b9   :  { %3003 = vmatpush3.bf16.msra.mxu0 %v3377_v12 }
 0x7ba   :  { %3004 = vmatprep.subr.bf16.mxu0 %v3378_v22 }
 0x7bc   :  { %2676 = vrot.lane.b32.xlu1 %v4321_v9, %s3810_s13  ;;  %v3379_v9 = vld [vmem:[%s4527_s17 + $0x18] sm:$0xff]  }
 0x7bd   :  { %3005 = vmatpush3.bf16.msra.mxu0 %v3379_v9 }
 0x7be   :  { %3006 = vmatprep.subr.bf16.mxu0 %v3380_v23 }
 0x7c0   :  { %2688 = vrot.lane.b32.xlu1 %v1452_v14, %s3810_s13  ;;  %v3386_v14 = vld [vmem:[%s4527_s17 + $0x78] sm:$0xff]  }
 0x7c1   :  { %3007 = vmatpush3.bf16.msra.mxu0 %v3381_v24 }
 0x7c2   :  { %3008 = vmatprep.subr.bf16.mxu0 %v3382_v55 }
 0x7c4   :  { %2692 = vrot.lane.b32.xlu1 %v1454_v29, %s3810_s13 }
 0x7c5   :  { %3009 = vmatpush3.bf16.msra.mxu0 %v3383_v62  ;;  %v3396_v62 = vld [vmem:[%s4531_s21] sm:$0xff]  }
 0x7c6   :  { %3010 = vmatprep.subr.bf16.mxu0 %v3384_v3 }
 0x7c9   :  { %3011 = vmatpush3.bf16.msra.mxu0 %v3385_v4 }
 0x7ca   :  { %3012 = vmatprep.subr.bf16.mxu0 %v3386_v14 }
 0x7cd   :  { %3013 = vmatpush3.bf16.msra.mxu0 %v3387_v6 }
 0x7ce   :  { %3106 = vmatprep.subr.bf16.mxu0 %v3396_v62 }
 0x7f3   :  { %v1681_v27 = vpop.f32.mrb[12].mxu1  ;;  %v1914_v35 = vpop.f32.mrb[16].mxu0 }
 0x7f4   :  { %v1683_v28 = vpop.f32.mrb[13].mxu1  ;;  %v1916_v37 = vpop.f32.mrb[17].mxu0 }
 0x7f5   :  { %v2019_v33 = vcombine.low %v1681_v27, %v1683_v28  ;;  %v1685_v34 = vpop.f32.mrb[14].mxu1  ;;  %v1918_v38 = vpop.f32.mrb[18].mxu0 }
 0x7f6   :  { %v1686_v36 = vpop.f32.mrb[15].mxu1  ;;  %v1919_v39 = vpop.f32.mrb[19].mxu0 }
 0x7f7   :  { %v2026_v41 = vrot.slane %v2019_v33, %v4259_v40 }
 0x7f9   :  { %v2027_v42 = vcombine.high %v2026_v41, %v2026_v41  ;;  %v2034_v43 = vrot.slane %v2026_v41, %v4259_v40 }
 0x7fb   :  { %v2041_v44 = vrot.slane %v2027_v42, %v4259_v40  ;;  %v2047_v45 = vrot.slane %v2034_v43, %v4262_v47  ;;  %v2051_v46 = vrot.slane %v2034_v43, %v4264_v48  ;;  %v2042_v49 = vcombine.high %v2034_v43, %v2034_v43 }
 0x7fd   :  { %v2043_v50 = vcombine.high %v2041_v44, %v2041_v44  ;;  %v2084_v51 = vadd.f32 %v2047_v45, %v1914_v35  ;;  %v2085_v52 = vadd.f32 %v2051_v46, %v1916_v37  ;;  %v2055_v53 = vrot.slane %v2041_v44, %v4262_v47 }
 0x7fe   :  { %v2059_v61 = vrot.slane %v2041_v44, %v4264_v48  ;;  %v2063_v54 = vrot.slane %v2042_v49, %v4262_v47  ;;  %v2067_v40 = vrot.slane %v2042_v49, %v4264_v48 }
 0x7ff   :  { %v2071_v56 = vrot.slane %v2043_v50, %v4262_v47  ;;  %v2075_v57 = vrot.slane %v2043_v50, %v4264_v48  ;;  %v2086_v58 = vadd.f32 %v2055_v53, %v1914_v35 }
 0x800   :  { %v2088_v63 = vadd.f32 %v2063_v54, %v1914_v35  ;;  %v2089_v0 = vadd.f32 %v2067_v40, %v1916_v37  ;;  %v3391_v40 = vld [vmem:[%s4529_s19 + $0x18] sm:$0xff]  }
 0x801   :  { %v2090_v1 = vadd.f32 %v2071_v56, %v1914_v35  ;;  %v2091_v2 = vadd.f32 %v2075_v57, %v1916_v37  ;;  %v3392_v56 = vld [vmem:[%s4529_s19 + $0x20] sm:$0xff]   ;;  %v3393_v57 = vld [vmem:[%s4529_s19 + $0x28] sm:$0xff]  }
 0x81a   :  { %v1939_v25 = vpop.permute.xlu0 %1938 }
 0x81b   :  { %2910 = vmatmul.mubr.msk.bf16.vlgmr.msra.gmra.mrb[16].mxu1 %vm1434_vm10, %v1939_v25 }
 0x81c   :  { %2006 = vmatprep.mubr.bf16.mxu1 %v3809_v60  ;;  %v2087_v60 = vadd.f32 %v2059_v61, %v1916_v37  ;;  %3087 = vmatpush3.bf16.msra.mxu1 %v3388_v8 }
 0x81d   :  { %3088 = vmatprep.subr.bf16.mxu1 %v3389_v10 }
 0x820   :  { %3089 = vmatpush3.bf16.msra.mxu1 %v3389_v10 }
 0x821   :  { %3090 = vmatprep.subr.bf16.mxu1 %v3390_v17 }
 0x822   :  { %v1941_v26 = vpop.permute.xlu1 %1940 }
 0x823   :  { %2911 = vmatmul.mubr.msk.bf16.gmra.mrb[20].mxu1 %vm1434_vm10, %v1941_v26 }
 0x824   :  { %3091 = vmatpush3.bf16.msra.mxu1 %v3390_v17 }
 0x825   :  { %3092 = vmatprep.subr.bf16.mxu1 %v3391_v40 }
 0x828   :  { %3093 = vmatpush3.bf16.msra.mxu1 %v3391_v40 }
 0x829   :  { %3094 = vmatprep.subr.bf16.mxu1 %v3392_v56 }
 0x82c   :  { %3095 = vmatpush3.bf16.msra.mxu1 %v3392_v56 }
 0x82d   :  { %3096 = vmatprep.subr.bf16.mxu1 %v3393_v57 }
 0x830   :  { %3097 = vmatpush3.bf16.msra.mxu1 %v3393_v57 }
 0x8ee   :  { %v1998_v59 = vpop.f32.mrb[16].mxu1 }
 0x8ef   :  { %v2092_v29 = vadd.f32 %v2084_v51, %v1998_v59  ;;  %v2000_v16 = vpop.f32.mrb[17].mxu1 }
 0x8f0   :  { %v2093_v18 = vadd.f32 %v2085_v52, %v2000_v16  ;;  %v2002_v30 = vpop.f32.mrb[18].mxu1 }
 0x8f1   :  { %v2112_v19 = vadd.f32 %v2105_v13, %v2092_v29  ;;  %v2094_v20 = vadd.f32 %v2086_v58, %v2002_v30  ;;  %v2004_v31 = vpop.f32.mrb[19].mxu1  ;;  %v3394_v58 = vld [vmem:[%s4529_s19 + $0x30] sm:$0xff]  }
 0x8f2   :  { %v2113_v32 = vadd.f32 %v2109_v15, %v2093_v18  ;;  %v2095_v5 = vadd.f32 %v2087_v60, %v2004_v31  ;;  %3098 = vmatprep.subr.bf16.mxu1 %v3394_v58  ;;  %v3395_v60 = vld [vmem:[%s4529_s19 + $0x38] sm:$0xff]  }
 0x8f3   :  { %v2128_v7 = vmul.f32 0.01, %v2112_v19  ;;  %v2114_v21 = vadd.f32 %v2105_v13, %v2094_v20  ;;  %vm2120_vm0 = vcmp.ge.f32.partialorder %v2112_v19, 0.0  ;;  %3099 = vmatpush3.bf16.msra.mxu1 %v3394_v58 }
 0x8f4   :  { %v2129_v12 = vmul.f32 0.01, %v2113_v32  ;;  %v2115_v22 = vadd.f32 %v2109_v15, %v2095_v5  ;;  %vm2121_vm1 = vcmp.ge.f32.partialorder %v2113_v32, 0.0  ;;  %3100 = vmatprep.subr.bf16.mxu1 %v3395_v60 }
 0x8f5   :  { %vm2122_vm2 = vcmp.ge.f32.partialorder %v2114_v21, 0.0  ;;  %v2130_v47 = vmul.f32 0.01, %v2114_v21  ;;  %v2136_v23 = vsel %vm2120_vm0, %v2112_v19, %v2128_v7 }
 0x8f6   :  { %vm2123_vm4 = vcmp.ge.f32.partialorder %v2115_v22, 0.0  ;;  %v2131_v9 = vmul.f32 0.01, %v2115_v22  ;;  %v2008_v48 = vpop.f32.mrb[20].mxu1  ;;  %v2137_v33 = vsel %vm2121_vm1, %v2113_v32, %v2129_v12 }
 0x8f7   :  { %v2138_v24 = vsel %vm2122_vm2, %v2114_v21, %v2130_v47  ;;  %v2096_v25 = vadd.f32 %v2088_v63, %v2008_v48  ;;  %v2010_v26 = vpop.f32.mrb[21].mxu1  ;;  %v3397_v63 = vld [vmem:[%s4531_s21 + $0x8] sm:$0xff]   ;;  %3101 = vmatpush3.bf16.msra.mxu1 %v3395_v60  ;;  %v3398_v47 = vld [vmem:[%s4531_s21 + $0x10] sm:$0xff]  }
 0x8f8   :  { %v2097_v27 = vadd.f32 %v2089_v0, %v2010_v26  ;;  %v2012_v28 = vpop.f32.mrb[22].mxu1  ;;  %v2139_v34 = vsel %vm2123_vm4, %v2115_v22, %v2131_v9  ;;  %v2144_v35 = vpack.c.bf16 %v2138_v24, %v2136_v23  ;;  %v3399_v9 = vld [vmem:[%s4531_s21 + $0x18] sm:$0xff]   ;;  %v2929_v48 = vld [vmem:[#allocation26] ss:$0 sm:$0xff] }
 0x8f9   :  { %v2116_v36 = vadd.f32 %v2105_v13, %v2096_v25  ;;  %v2098_v37 = vadd.f32 %v2090_v1, %v2012_v28  ;;  %v2014_v38 = vpop.f32.mrb[23].mxu1  ;;  %v2145_v39 = vpack.c.bf16 %v2139_v34, %v2137_v33  ;;  %v2912_v1 = vld [vmem:[#allocation24] ss:$0 sm:$0xff] }
 0x8fa   :  { %v2117_v41 = vadd.f32 %v2109_v15, %v2097_v27  ;;  %v2099_v42 = vadd.f32 %v2091_v2, %v2014_v38 }
 0x8fb   :  { %v2132_v43 = vmul.f32 0.01, %v2116_v36  ;;  %v2118_v44 = vadd.f32 %v2105_v13, %v2098_v37  ;;  %2315 = vmatprep.mubr.bf16.mxu0 %v2145_v39  ;;  %vm2124_vm5 = vcmp.ge.f32.partialorder %v2116_v36, 0.0 }
 0x8fc   :  { %v2133_v45 = vmul.f32 0.01, %v2117_v41  ;;  %v2119_v46 = vadd.f32 %v2109_v15, %v2099_v42  ;;  %2316 = vmatmul.mubr.bf16.vlgmr.msra.gmra.mrb[20].mxu0 %v2144_v35  ;;  %vm2125_vm6 = vcmp.ge.f32.partialorder %v2117_v41, 0.0 }
 0x8fd   :  { %vm2126_vm7 = vcmp.ge.f32.partialorder %v2118_v44, 0.0  ;;  %v2134_v49 = vmul.f32 0.01, %v2118_v44  ;;  %v2140_v51 = vsel %vm2124_vm5, %v2116_v36, %v2132_v43  ;;  %3107 = vmatpush3.bf16.msra.mxu0 %v3396_v62 }
 0x8fe   :  { %vm2127_vm9 = vcmp.ge.f32.partialorder %v2119_v46, 0.0  ;;  %v2135_v50 = vmul.f32 0.01, %v2119_v46  ;;  %v2141_v53 = vsel %vm2125_vm6, %v2117_v41, %v2133_v45  ;;  %3108 = vmatprep.subr.bf16.mxu0 %v3397_v63  ;;  %vm2698_vm6 = vcmask 7168  }
 0x8ff   :  { %v2142_v52 = vsel %vm2126_vm7, %v2118_v44, %v2134_v49  ;;  %v3401_v49 = vld [vmem:[%s4533_s23 + $0x8] sm:$0xff]   ;;  %vm2703_vm7 = vcmask 23552  }
 0x900   :  { %v2143_v61 = vsel %vm2127_vm9, %v2119_v46, %v2135_v50  ;;  %v2146_v54 = vpack.c.bf16 %v2142_v52, %v2140_v51  ;;  %v3400_v46 = vld [vmem:[%s4533_s23] sm:$0xff]   ;;  %vm2708_vm9 = vcmask 56320  }
 0x901   :  { %v2147_v55 = vpack.c.bf16 %v2143_v61, %v2141_v53  ;;  %3109 = vmatpush3.bf16.msra.mxu0 %v3397_v63  ;;  %3118 = vmatprep.subr.bf16.mxu1 %v3400_v46  ;;  %v2938_v50 = vld [vmem:[%s4532_s22] ss:$0 sm:$0xff]  ;;  %s3811_s22 = smov [#allocation27]  }
 0x902   :  { %3110 = vmatprep.subr.bf16.mxu0 %v3398_v47  ;;  %s2723_s23 = sshll.u32 %s3811_s22, 4  ;;  %s2724_s23 = int_to_ptr.vmem [resolvable:$true] %s2723_s23 }
 0x903   :  { %2323 = vmatprep.mubr.bf16.mxu0 %v2147_v55  ;;  %s3748_s0 = scalar_lea.vmem %s2724_s23, 512  ;;  %p3753_p9 = scmp.lt.s32.totalorder %s2724_s23, %s2724_s23 }
 0x904   :  { %2324 = vmatmul.mubr.bf16.gmra.mrb[24].mxu0 %v2146_v54  ;;  %p3749_p8 = scmp.ne.s32.totalorder %s2724_s23, %s3748_s0  ;;  %p3754_p10 = scmp.lt.s32.totalorder %s3748_s0, %s3748_s0 }
 0x905   :  { %3111 = vmatpush3.bf16.msra.mxu0 %v3398_v47 }
 0x906   :  { %3112 = vmatprep.subr.bf16.mxu0 %v3399_v9  ;;  %p3755_p11 = por %p3754_p10, %p3753_p9 }
 0x908   :  { %p3756_p12 = pnand %p3755_p11, %p3749_p8 }
 0x909   :  { %3113 = vmatpush3.bf16.msra.mxu0 %v3399_v9 }
 0x9cf   :  { %v3014_v0 = vpop.f32.mrb[20].mxu0 }
 0x9d0   :  { %v3015_v2 = vpop.f32.mrb[21].mxu0 }
 0x9d1   :  { %v3016_v3 = vadd.f32 %v3015_v2, %v3014_v0  ;;  %v3017_v4 = vpop.f32.mrb[22].mxu0 }
 0x9d2   :  { %v3018_v14 = vpop.f32.mrb[23].mxu0 }
 0x9d3   :  { %v2318_v6 = vadd.f32 %v3016_v3, %v2912_v1  ;;  %v3019_v8 = vadd.f32 %v3018_v14, %v3017_v4  ;;  %v2671_v14 = vpop.permute.xlu1 %2670 }
 0x9d5   :  { %v2336_v10 = vmul.f32 0.01, %v2318_v6  ;;  %v2321_v17 = vadd.f32 %v3019_v8, %v2912_v1  ;;  %vm2332_vm10 = vcmp.ge.f32.partialorder %v2318_v6, 0.0  ;;  %v2675_v8 = vpop.permute.xlu0 %2674 }
 0x9d7   :  { %vm2333_vm11 = vcmp.ge.f32.partialorder %v2321_v17, 0.0  ;;  %v2337_v11 = vmul.f32 0.01, %v2321_v17  ;;  %v3020_v13 = vpop.f32.mrb[24].mxu0  ;;  %v2340_v16 = vsel %vm2332_vm10, %v2318_v6, %v2336_v10  ;;  %v2673_v6 = vpop.permute.xlu1 %2672 }
 0x9d8   :  { %v3021_v59 = vpop.f32.mrb[25].mxu0 }
 0x9d9   :  { %v3022_v15 = vadd.f32 %v3021_v59, %v3020_v13  ;;  %v3023_v29 = vpop.f32.mrb[26].mxu0  ;;  %v2341_v18 = vsel %vm2333_vm11, %v2321_v17, %v2337_v11  ;;  %v2687_v17 = vpop.permute.xlu0 %2686  ;;  %v2945_v11 = vld [vmem:[#allocation2] ss:$0 sm:$0xff] }
 0x9da   :  { %v3024_v30 = vpop.f32.mrb[27].mxu0  ;;  %v2344_v19 = vpack.c.bf16 %v2341_v18, %v2340_v16 }
 0x9db   :  { %v2326_v20 = vadd.f32 %v3022_v15, %v2912_v1  ;;  %v3025_v31 = vadd.f32 %v3024_v30, %v3023_v29  ;;  %v2677_v10 = vpop.permute.xlu1 %2676 }
 0x9dc   :  { %3102 = vmatprep.mubr.bf16.mxu1 %v2344_v19 }
 0x9dd   :  { %v2338_v32 = vmul.f32 0.01, %v2326_v20  ;;  %v2329_v5 = vadd.f32 %v3025_v31, %v2912_v1  ;;  %vm2334_vm12 = vcmp.ge.f32.partialorder %v2326_v20, 0.0  ;;  %v2691_v30 = vpop.permute.xlu0 %2690 }
 0x9df   :  { %vm2335_vm13 = vcmp.ge.f32.partialorder %v2329_v5, 0.0  ;;  %v2339_v7 = vmul.f32 0.01, %v2329_v5  ;;  %v2342_v21 = vsel %vm2334_vm12, %v2326_v20, %v2338_v32  ;;  %v2689_v13 = vpop.permute.xlu1 %2688 }
 0x9e1   :  { %v2343_v12 = vsel %vm2335_vm13, %v2329_v5, %v2339_v7 }
 0x9e2   :  { %v2345_v22 = vpack.c.bf16 %v2343_v12, %v2342_v21 }
 0x9e3   :  { %v2693_v21 = vpop.permute.xlu1 %2692 }
 0x9e4   :  { %3103 = vmatmul.mubr.bf16.vlgmr.msra.gmra.mrb[24].mxu1 %v2345_v22 }
 0x9e5   :  { %3119 = vmatpush3.bf16.msra.mxu1 %v3400_v46 }
 0x9e6   :  { %3120 = vmatprep.subr.bf16.mxu1 %v3401_v49 }
 0x9e9   :  { %3121 = vmatpush3.bf16.msra.mxu1 %v3401_v49 }
 0xab7   :  { %v3104_v23 = vpop.f32.mrb[24].mxu1 }
 0xab8   :  { %v2460_v24 = vadd.f32 %v3104_v23, %v2929_v48  ;;  %v2451_v25 = vpop.f32.mrb[25].mxu1 }
 0xab9   :  { %v2452_v26 = vadd.f32 %v2929_v48, %v2451_v25  ;;  %v3105_v27 = vpop.f32.mrb[26].mxu1 }
 0xaba   :  { %v2472_v28 = vmul.f32 0.01, %v2460_v24  ;;  %v2463_v33 = vadd.f32 %v3105_v27, %v2929_v48  ;;  %v2454_v34 = vpop.f32.mrb[27].mxu1  ;;  %vm2468_vm14 = vcmp.ge.f32.partialorder %v2460_v24, 0.0 }
 0xabb   :  { %v2470_v35 = vmul.f32 0.01, %v2452_v26  ;;  %v2455_v36 = vadd.f32 %v2929_v48, %v2454_v34  ;;  %vm2466_vm15 = vcmp.ge.f32.partialorder %v2452_v26, 0.0 }
 0xabc   :  { %vm2469_vm0 = vcmp.ge.f32.partialorder %v2463_v33, 0.0  ;;  %v2473_v37 = vmul.f32 0.01, %v2463_v33  ;;  %v2476_v39 = vsel %vm2468_vm14, %v2460_v24, %v2472_v28 }
 0xabd   :  { %vm2467_vm1 = vcmp.ge.f32.partialorder %v2455_v36, 0.0  ;;  %v2471_v38 = vmul.f32 0.01, %v2455_v36  ;;  %v2474_v42 = vsel %vm2466_vm15, %v2452_v26, %v2470_v35 }
 0xabe   :  { %v2477_v41 = vsel %vm2469_vm0, %v2463_v33, %v2473_v37 }
 0xabf   :  { %v2479_v43 = vpack.c.bf16 %v2477_v41, %v2476_v39  ;;  %v2475_v44 = vsel %vm2467_vm1, %v2455_v36, %v2471_v38 }
 0xac0   :  { %v2478_v45 = vpack.c.bf16 %v2475_v44, %v2474_v42 }
 0xac2   :  { %3114 = vmatprep.mubr.msk.bf16.mxu0 %vm1244_vm3, %v2478_v45 }
 0xac3   :  { %3115 = vmatmul.mubr.msk.bf16.vlgmr.msra.gmra.mrb[28].mxu0 %vm1244_vm3, %v2479_v43 }
 0xb96   :  { %v3116_v51 = vpop.f32.mrb[28].mxu0 }
 0xb97   :  { %v2568_v52 = vadd.f32 %v3116_v51, %v2938_v50  ;;  %v2559_v53 = vpop.f32.mrb[29].mxu0 }
 0xb98   :  { %v2560_v61 = vadd.f32 %v2938_v50, %v2559_v53  ;;  %v3117_v54 = vpop.f32.mrb[30].mxu0 }
 0xb99   :  { %v2580_v55 = vmul.f32 0.01, %v2568_v52  ;;  %v2571_v40 = vadd.f32 %v3117_v54, %v2938_v50  ;;  %v2562_v56 = vpop.f32.mrb[31].mxu0  ;;  %vm2576_vm3 = vcmp.ge.f32.partialorder %v2568_v52, 0.0 }
 0xb9a   :  { %v2578_v57 = vmul.f32 0.01, %v2560_v61  ;;  %v2563_v58 = vadd.f32 %v2938_v50, %v2562_v56  ;;  %vm2574_vm2 = vcmp.ge.f32.partialorder %v2560_v61, 0.0 }
 0xb9b   :  { %vm2577_vm4 = vcmp.ge.f32.partialorder %v2571_v40, 0.0  ;;  %v2581_v60 = vmul.f32 0.01, %v2571_v40  ;;  %v2584_v63 = vsel %vm2576_vm3, %v2568_v52, %v2580_v55 }
 0xb9c   :  { %vm2575_vm5 = vcmp.ge.f32.partialorder %v2563_v58, 0.0  ;;  %v2579_v62 = vmul.f32 0.01, %v2563_v58  ;;  %v2582_v1 = vsel %vm2574_vm2, %v2560_v61, %v2578_v57 }
 0xb9d   :  { %v2585_v0 = vsel %vm2577_vm4, %v2571_v40, %v2581_v60 }
 0xb9e   :  { %v2587_v2 = vpack.c.bf16 %v2585_v0, %v2584_v63  ;;  %v2583_v3 = vsel %vm2575_vm5, %v2563_v58, %v2579_v62 }
 0xb9f   :  { %v2586_v4 = vpack.c.bf16 %v2583_v3, %v2582_v1 }
 0xba1   :  { %3122 = vmatprep.mubr.msk.bf16.mxu1 %vm1337_vm8, %v2586_v4 }
 0xba2   :  { %3123 = vmatmul.mubr.msk.bf16.vlgmr.msra.gmra.mrb[28].mxu1 %vm1337_vm8, %v2587_v2  ;;  %vm2713_vm8 = vcmask 64512  }
 0xc75   :  { %v3124_v59 = vpop.f32.mrb[28].mxu1 }
 0xc76   :  { %v2660_v15 = vadd.f32 %v3124_v59, %v2945_v11  ;;  %v2651_v29 = vpop.f32.mrb[29].mxu1 }
 0xc77   :  { %v2652_v16 = vadd.f32 %v2945_v11, %v2651_v29  ;;  %v3125_v18 = vpop.f32.mrb[30].mxu1 }
 0xc78   :  { %v2701_v19 = vsel %vm2698_vm6, %v2660_v15, %v2675_v8  ;;  %v2663_v20 = vadd.f32 %v3125_v18, %v2945_v11  ;;  %v2654_v31 = vpop.f32.mrb[31].mxu1 }
 0xc79   :  { %v2706_v32 = vsel %vm2703_vm7, %v2701_v19, %v2691_v30  ;;  %v2699_v5 = vsel %vm2698_vm6, %v2652_v16, %v2671_v14  ;;  %v2655_v7 = vadd.f32 %v2945_v11, %v2654_v31 }
 0xc7a   :  { %v2711_v12 = vsel %vm2708_vm9, %v2706_v32, 0.0  ;;  %v2704_v22 = vsel %vm2703_vm7, %v2699_v5, %v2687_v17  ;;  %v2702_v47 = vsel %vm2698_vm6, %v2663_v20, %v2677_v10 }
 0xc7b   :  { %v2709_v9 = vsel %vm2708_vm9, %v2704_v22, 0.0  ;;  %v2707_v48 = vsel %vm2703_vm7, %v2702_v47, %v2693_v21  ;;  %v2700_v23 = vsel %vm2698_vm6, %v2655_v7, %v2673_v6  ;;  %2716 = vst.msk [vmem:[#allocation27 + $0x10] sm:$0xff] %vm2713_vm8, %v2711_v12 }
 0xc7c   :  { %v2712_v24 = vsel %vm2708_vm9, %v2707_v48, 0.0  ;;  %v2705_v25 = vsel %vm2703_vm7, %v2700_v23, %v2689_v13  ;;  %2714 = vst.msk [vmem:[#allocation27] sm:$0xff] %vm2713_vm8, %v2709_v9 }
 0xc7d   :  { %v2710_v26 = vsel %vm2708_vm9, %v2705_v25, 0.0  ;;  %2717 = vst.msk [vmem:[#allocation27 + $0x18] sm:$0xff] %vm2713_vm8, %v2712_v24 }
 0xc7e   :  { %2715 = vst.msk [vmem:[#allocation27 + $0x8] sm:$0xff] %vm2713_vm8, %v2710_v26 }
 0xc7f   :  { %3759 = shalt.err (!%p3756_p12)
}
 0xc80   :  { %s3760_s20 = scalar_lea.hbm %s4535_s25, 512 }
 0xc81   :  { %p3761_p13 = scmp.ne.s32.totalorder %s4535_s25, %s3760_s20  ;;  %p3764_p0 = scmp.lt.u32.totalorder %s3760_s20, %s4535_s25 }
 0xc83   :  { %p3766_p1 = pnand %p3764_p0, %p3761_p13 }
 0xc85   :  { %3769 = shalt.err (!%p3766_p1)
}
 0xc86   :  { %2729 = dma.vmem_to_hbm [thread:$0]  %s2724_s23, 512, %s4535_s25, [#allocation5], %s3794_s29, %s3794_s29, %s3795_s4  }
 0xc87   :  { %3786 = dma.done.wait [#allocation5], 512  }
 0xc88   :  { %3787 = vsyncadd [#allocation5], 4294966784 }
 0xc89   :  { %2733 = vsyncpa [#allocation4], 1 }
 0xc8a   :  { %2734 = vsyncpa [#allocation7], 1 }
 0xc8b   :  { %2735 = vsyncpa [#allocation10], 1 }
 0xc8c   :  { %2736 = vsyncpa [#allocation13], 1 }
 0xc8d   :  { %2737 = vsyncpa [#allocation16], 1 }
 0xc8e   :  { %2738 = vsyncpa [#allocation19], 1 }
 0xc8f   :  { %2739 = vsyncpa [#allocation22], 1 }
 0xc90   :  { %2740 = vsyncpa [#allocation25], 1 }
 0xc91   :  { %2741 = vsyncpa [#allocation5], 1 }

</bundles_post_ra>
